<compile_context>
chip_gen: v6e
topology: v6e:2x2x1
jax: 0.10.0
libtpu: 0.0.40
codegen_flags: <defaults>
</compile_context>

<pallas_src>
import functools

import jax
import jax.numpy as jnp
from jax.experimental import pallas as pl
from jax.experimental.pallas import tpu as pltpu


def conv_stats_kernel(xp_ref, w_ref, b_ref, conv_ref, stats_ref,
                      *, KH, KW, stride):
    """Pass 1, one batch element per grid step.

    xp_ref:    (1, Hp, Wp, Cin)        padded NHWC input slice
    w_ref:     (KH*KW*Cin, Cout)       conv weight, (kh, kw, cin)-major rows
    b_ref:     (1, Cout)               conv bias
    conv_ref:  (1, Ho, Wo, Cout)       pre-pool activation (conv + bias)
    stats_ref: (1, 2, Cout)            row 0: per-element sum, row 1: sum of squares
    """
    _, Ho, Wo, Cout = conv_ref.shape
    Cin = xp_ref.shape[3]
    rows = Ho * Wo

    # im2col: concatenate the KH*KW shifted windows along the contraction axis
    # so the whole conv is a single (rows, KH*KW*Cin) @ (KH*KW*Cin, Cout) GEMM.
    cols = []
    for kh in range(KH):
        for kw in range(KW):
            if stride == 1:
                hs, ws = pl.ds(kh, Ho), pl.ds(kw, Wo)
            else:
                hs, ws = pl.ds(kh, Ho, stride), pl.ds(kw, Wo, stride)
            cols.append(xp_ref[:, hs, ws, :].reshape(rows, Cin))
    patch = jnp.concatenate(cols, axis=1)                    # (rows, KH*KW*Cin)

    acc = jnp.dot(patch, w_ref[...],
                  preferred_element_type=jnp.float32)        # (rows, Cout)
    acc = acc + b_ref[0]

    # Single-pass BN partials (var = E[x^2] - mean^2 is assembled in the
    # wrapper); reduced over this element's rows only -> batch axis stays
    # parallel.  Packed into one tiny output block.
    ssum = jnp.sum(acc, axis=0, keepdims=True)               # (1, Cout)
    ssq = jnp.sum(acc * acc, axis=0, keepdims=True)          # (1, Cout)
    stats_ref[...] = jnp.concatenate([ssum, ssq], axis=0).reshape(1, 2, Cout)

    conv_ref[...] = acc.reshape(1, Ho, Wo, Cout)


def bn_relu_pool_kernel(conv_ref, ss_ref, o_ref):
    """Pass 2, one batch element per grid step.

    conv_ref: (1, Ho, Wo, Cout)   pre-pool activation
    ss_ref:   (2, Cout)           row 0: gamma / sqrt(var + eps), row 1: beta - mean * scale
    o_ref:    (1, Ho2, Wo2, Cout) pooled output
    """
    _, Ho2, Wo2, Cout = o_ref.shape

    # Hoist the broadcasts out of the 2x2 window loop.
    scale = jnp.broadcast_to(ss_ref[0].reshape(1, 1, 1, Cout),
                             (1, Ho2, Wo2, Cout))
    shift = jnp.broadcast_to(ss_ref[1].reshape(1, 1, 1, Cout),
                             (1, Ho2, Wo2, Cout))

    # 2x2 max-pool directly from the pipelined input block: four stride-2
    # window reads.  BN affine + ReLU are elementwise, so applying them per
    # window before the max equals applying them once before the pool.
    pooled = None
    for di in range(2):
        for dj in range(2):
            part = conv_ref[:, pl.ds(di, Ho2, 2), pl.ds(dj, Wo2, 2), :]
            part = jnp.maximum(part * scale + shift, 0.0)
            pooled = part if pooled is None else jnp.maximum(pooled, part)

    o_ref[...] = pooled.astype(o_ref.dtype)


def conv_block(x, w, b, gamma, beta, *, stride=1, padding=1, eps=1e-5):
    """x: (N, Cin, H, W) NCHW, w: (Cout, Cin, KH, KW) OIHW -> (N, Cout, Ho//2, Wo//2)."""
    N, Cin, H, W = x.shape
    Cout, _, KH, KW = w.shape
    Ho = (H + 2 * padding - KH) // stride + 1
    Wo = (W + 2 * padding - KW) // stride + 1
    assert Ho % 2 == 0 and Wo % 2 == 0, "MaxPool2d(2) with these shapes"
    Ho2, Wo2 = Ho // 2, Wo // 2

    # Boundary glue: NCHW -> NHWC (+ zero pad), OIHW -> (KH*KW*Cin, Cout).
    xn = jnp.transpose(x, (0, 2, 3, 1)).astype(jnp.float32)
    xp = jnp.pad(xn, ((0, 0), (padding, padding), (padding, padding), (0, 0)))
    wmat = jnp.transpose(w, (2, 3, 1, 0)).astype(jnp.float32)
    wmat = wmat.reshape(KH * KW * Cin, Cout)
    b2 = b.reshape(1, Cout).astype(jnp.float32)
    Hp, Wp = xp.shape[1], xp.shape[2]

    # ---------------- Pass 1: conv + per-element BN partials -----------------
    k1 = functools.partial(conv_stats_kernel, KH=KH, KW=KW, stride=stride)
    flops1 = 2 * N * Ho * Wo * KH * KW * Cin * Cout
    bytes1 = 4 * (xp.size + wmat.size + b2.size
                  + N * Ho * Wo * Cout + 2 * N * Cout)
    conv_out, stats = pl.pallas_call(
        k1,
        grid=(N,),
        in_specs=[
            pl.BlockSpec((1, Hp, Wp, Cin), lambda n: (n, 0, 0, 0)),
            pl.BlockSpec((KH * KW * Cin, Cout), lambda n: (0, 0)),
            pl.BlockSpec((1, Cout), lambda n: (0, 0)),
        ],
        out_specs=[
            pl.BlockSpec((1, Ho, Wo, Cout), lambda n: (n, 0, 0, 0)),
            pl.BlockSpec((1, 2, Cout), lambda n: (n, 0, 0)),
        ],
        out_shape=[
            jax.ShapeDtypeStruct((N, Ho, Wo, Cout), jnp.float32),
            jax.ShapeDtypeStruct((N, 2, Cout), jnp.float32),
        ],
        compiler_params=pltpu.CompilerParams(dimension_semantics=("parallel",)),
        cost_estimate=pl.CostEstimate(flops=flops1, transcendentals=0,
                                      bytes_accessed=bytes1),
    )(xp, wmat, b2)

    # ---- Tiny cross-batch reduction of BN partials (training-mode BN) -------
    count = N * Ho * Wo
    mean = jnp.sum(stats[:, 0, :], axis=0) / count
    var = jnp.sum(stats[:, 1, :], axis=0) / count - mean * mean   # biased var
    inv = jax.lax.rsqrt(var + eps)
    scale = gamma.astype(jnp.float32) * inv
    shift = beta.astype(jnp.float32) - mean * scale
    ss = jnp.stack([scale, shift], axis=0)                         # (2, Cout)

    # ---------------- Pass 2: BN affine + ReLU + 2x2 max-pool ----------------
    flops2 = 6 * N * Ho * Wo * Cout
    bytes2 = 4 * (N * Ho * Wo * Cout + 2 * Cout + N * Ho2 * Wo2 * Cout)
    out = pl.pallas_call(
        bn_relu_pool_kernel,
        grid=(N,),
        in_specs=[
            pl.BlockSpec((1, Ho, Wo, Cout), lambda n: (n, 0, 0, 0)),
            pl.BlockSpec((2, Cout), lambda n: (0, 0)),
        ],
        out_specs=pl.BlockSpec((1, Ho2, Wo2, Cout), lambda n: (n, 0, 0, 0)),
        out_shape=jax.ShapeDtypeStruct((N, Ho2, Wo2, Cout), jnp.float32),
        compiler_params=pltpu.CompilerParams(dimension_semantics=("parallel",)),
        cost_estimate=pl.CostEstimate(flops=flops2, transcendentals=0,
                                      bytes_accessed=bytes2),
    )(conv_out, ss)

    return jnp.transpose(out, (0, 3, 1, 2))   # NHWC-pooled -> NCHW


def ref_forward(x, w, b, gamma, beta, stride, padding, eps=1e-5):
    """Plain-JAX reference of the PyTorch forward (training-mode BN)."""
    y = jax.lax.conv_general_dilated(
        x, w, window_strides=(stride, stride),
        padding=[(padding, padding), (padding, padding)],
        dimension_numbers=("NCHW", "OIHW", "NCHW"),
        precision=jax.lax.Precision.HIGHEST)
    y = y + b[None, :, None, None]
    mean = jnp.mean(y, axis=(0, 2, 3), keepdims=True)
    var = jnp.mean((y - mean) ** 2, axis=(0, 2, 3), keepdims=True)
    y = (y - mean) * jax.lax.rsqrt(var + eps)
    y = y * gamma[None, :, None, None] + beta[None, :, None, None]
    y = jnp.maximum(y, 0.0)
    y = jax.lax.reduce_window(y, -jnp.inf, jax.lax.max,
                              (1, 1, 2, 2), (1, 1, 2, 2), "VALID")
    return y


if __name__ == "__main__":
    # ConvBlock(in_channels=4, out_channels=8, kernel_size=3, stride=1, padding=1)
    N, Cin, Cout, H, W = 2, 4, 8, 16, 16
    K, stride, padding = 3, 1, 1

    key = jax.random.PRNGKey(0)
    kx, kw, kb, kg, kbe = jax.random.split(key, 5)
    x = jax.random.normal(kx, (N, Cin, H, W), jnp.float32)
    w = 0.1 * jax.random.normal(kw, (Cout, Cin, K, K), jnp.float32)
    b = 0.1 * jax.random.normal(kb, (Cout,), jnp.float32)
    gamma = 1.0 + 0.1 * jax.random.normal(kg, (Cout,), jnp.float32)
    beta = 0.1 * jax.random.normal(kbe, (Cout,), jnp.float32)

    out = conv_block(x, w, b, gamma, beta, stride=stride, padding=padding)
    out = jax.block_until_ready(out)

    ref = ref_forward(x, w, b, gamma, beta, stride, padding)
    assert out.shape == ref.shape == (N, Cout, H // 2, W // 2)
    assert float(jnp.max(jnp.abs(out - ref))) < 1e-3, "mismatch vs reference"

    print("KERNEL_OK")
</pallas_src>

<mosaic_0001>
module attributes {stable_mosaic.version = 11 : i64} {
  func.func @conv_stats_kernel(%arg0: i32, %arg1: memref<1x18x18x4xf32, #tpu.memory_space<vmem>>, %arg2: memref<36x8xf32, #tpu.memory_space<vmem>>, %arg3: memref<1x8xf32, #tpu.memory_space<vmem>>, %arg4: memref<1x16x16x8xf32, #tpu.memory_space<vmem>>, %arg5: memref<1x2x8xf32, #tpu.memory_space<vmem>>) attributes {dimension_semantics = [#tpu.dimension_semantics<parallel>], iteration_bounds = array<i64: 2>, scalar_prefetch = 0 : i64, scratch_operands = 0 : i64, tpu.core_type = #tpu.core_type<tc>, window_params = [{transform_indices = @transform_0, window_bounds = array<i64: 1, 18, 18, 4>}, {pipeline_mode = #tpu.pipeline_mode<synchronous>, transform_indices = @transform_1, window_bounds = array<i64: 36, 8>}, {pipeline_mode = #tpu.pipeline_mode<synchronous>, transform_indices = @transform_2, window_bounds = array<i64: 1, 8>}, {transform_indices = @transform_3, window_bounds = array<i64: 1, 16, 16, 8>}, {transform_indices = @transform_4, window_bounds = array<i64: 1, 2, 8>}]} {
    %c0 = arith.constant 0 : index
    %c0_0 = arith.constant 0 : index
    %c0_1 = arith.constant 0 : index
    %c0_2 = arith.constant 0 : index
    %0 = vector.load %arg1[%c0, %c0_0, %c0_1, %c0_2] : memref<1x18x18x4xf32, #tpu.memory_space<vmem>>, vector<1x16x16x4xf32>
    %1 = vector.shape_cast %0 : vector<1x16x16x4xf32> to vector<256x4xf32>
    %c0_3 = arith.constant 0 : index
    %c0_4 = arith.constant 0 : index
    %c1 = arith.constant 1 : index
    %c0_5 = arith.constant 0 : index
    %2 = vector.load %arg1[%c0_3, %c0_4, %c1, %c0_5] : memref<1x18x18x4xf32, #tpu.memory_space<vmem>>, vector<1x16x16x4xf32>
    %3 = vector.shape_cast %2 : vector<1x16x16x4xf32> to vector<256x4xf32>
    %c0_6 = arith.constant 0 : index
    %c0_7 = arith.constant 0 : index
    %c2 = arith.constant 2 : index
    %c0_8 = arith.constant 0 : index
    %4 = vector.load %arg1[%c0_6, %c0_7, %c2, %c0_8] : memref<1x18x18x4xf32, #tpu.memory_space<vmem>>, vector<1x16x16x4xf32>
    %5 = vector.shape_cast %4 : vector<1x16x16x4xf32> to vector<256x4xf32>
    %c0_9 = arith.constant 0 : index
    %c1_10 = arith.constant 1 : index
    %c0_11 = arith.constant 0 : index
    %c0_12 = arith.constant 0 : index
    %6 = vector.load %arg1[%c0_9, %c1_10, %c0_11, %c0_12] : memref<1x18x18x4xf32, #tpu.memory_space<vmem>>, vector<1x16x16x4xf32>
    %7 = vector.shape_cast %6 : vector<1x16x16x4xf32> to vector<256x4xf32>
    %c0_13 = arith.constant 0 : index
    %c1_14 = arith.constant 1 : index
    %c1_15 = arith.constant 1 : index
    %c0_16 = arith.constant 0 : index
    %8 = vector.load %arg1[%c0_13, %c1_14, %c1_15, %c0_16] : memref<1x18x18x4xf32, #tpu.memory_space<vmem>>, vector<1x16x16x4xf32>
    %9 = vector.shape_cast %8 : vector<1x16x16x4xf32> to vector<256x4xf32>
    %c0_17 = arith.constant 0 : index
    %c1_18 = arith.constant 1 : index
    %c2_19 = arith.constant 2 : index
    %c0_20 = arith.constant 0 : index
    %10 = vector.load %arg1[%c0_17, %c1_18, %c2_19, %c0_20] : memref<1x18x18x4xf32, #tpu.memory_space<vmem>>, vector<1x16x16x4xf32>
    %11 = vector.shape_cast %10 : vector<1x16x16x4xf32> to vector<256x4xf32>
    %c0_21 = arith.constant 0 : index
    %c2_22 = arith.constant 2 : index
    %c0_23 = arith.constant 0 : index
    %c0_24 = arith.constant 0 : index
    %12 = vector.load %arg1[%c0_21, %c2_22, %c0_23, %c0_24] : memref<1x18x18x4xf32, #tpu.memory_space<vmem>>, vector<1x16x16x4xf32>
    %13 = vector.shape_cast %12 : vector<1x16x16x4xf32> to vector<256x4xf32>
    %c0_25 = arith.constant 0 : index
    %c2_26 = arith.constant 2 : index
    %c1_27 = arith.constant 1 : index
    %c0_28 = arith.constant 0 : index
    %14 = vector.load %arg1[%c0_25, %c2_26, %c1_27, %c0_28] : memref<1x18x18x4xf32, #tpu.memory_space<vmem>>, vector<1x16x16x4xf32>
    %15 = vector.shape_cast %14 : vector<1x16x16x4xf32> to vector<256x4xf32>
    %c0_29 = arith.constant 0 : index
    %c2_30 = arith.constant 2 : index
    %c2_31 = arith.constant 2 : index
    %c0_32 = arith.constant 0 : index
    %16 = vector.load %arg1[%c0_29, %c2_30, %c2_31, %c0_32] : memref<1x18x18x4xf32, #tpu.memory_space<vmem>>, vector<1x16x16x4xf32>
    %17 = vector.shape_cast %16 : vector<1x16x16x4xf32> to vector<256x4xf32>
    %18 = tpu.concatenate %1, %3, %5, %7, %9, %11, %13, %15, %17 in 1 : vector<256x4xf32>, vector<256x4xf32>, vector<256x4xf32>, vector<256x4xf32>, vector<256x4xf32>, vector<256x4xf32>, vector<256x4xf32>, vector<256x4xf32>, vector<256x4xf32> -> vector<256x36xf32>
    %c0_33 = arith.constant 0 : index
    %c0_34 = arith.constant 0 : index
    %19 = vector.load %arg2[%c0_33, %c0_34] : memref<36x8xf32, #tpu.memory_space<vmem>>, vector<36x8xf32>
    %cst = arith.constant dense<0.000000e+00> : vector<256x8xf32>
    %20 = tpu.matmul %18, %19, %cst {dimension_numbers = #tpu.dot_dimension_numbers<[1], [0], [0], [1], [0, 0, 1, 1], [], []>} : vector<256x36xf32>, vector<36x8xf32>, vector<256x8xf32> -> vector<256x8xf32>
    %c0_35 = arith.constant 0 : index
    %c0_36 = arith.constant 0 : index
    %21 = vector.load %arg3[%c0_35, %c0_36] : memref<1x8xf32, #tpu.memory_space<vmem>>, vector<1x8xf32>
    %22 = vector.shape_cast %21 : vector<1x8xf32> to vector<8xf32>
    %23 = vector.shape_cast %22 : vector<8xf32> to vector<1x8xf32>
    %24 = vector.broadcast %23 : vector<1x8xf32> to vector<256x8xf32>
    %25 = arith.addf %20, %24 : vector<256x8xf32>
    %cst_37 = arith.constant dense<0.000000e+00> : vector<8xf32>
    %26 = vector.multi_reduction <add>, %25, %cst_37 [0] : vector<256x8xf32> to vector<8xf32>
    %27 = vector.shape_cast %26 : vector<8xf32> to vector<1x8xf32>
    %28 = arith.mulf %25, %25 : vector<256x8xf32>
    %cst_38 = arith.constant dense<0.000000e+00> : vector<8xf32>
    %29 = vector.multi_reduction <add>, %28, %cst_38 [0] : vector<256x8xf32> to vector<8xf32>
    %30 = vector.shape_cast %29 : vector<8xf32> to vector<1x8xf32>
    %31 = tpu.concatenate %27, %30 in 0 : vector<1x8xf32>, vector<1x8xf32> -> vector<2x8xf32>
    %32 = vector.shape_cast %31 : vector<2x8xf32> to vector<1x2x8xf32>
    %c0_39 = arith.constant 0 : index
    %c0_40 = arith.constant 0 : index
    %c0_41 = arith.constant 0 : index
    %33 = vector.load %arg5[%c0_39, %c0_40, %c0_41] : memref<1x2x8xf32, #tpu.memory_space<vmem>>, vector<1x2x8xf32>
    tpu.vector_store %arg5[%c0_39, %c0_40, %c0_41], %32 {strides = array<i32>} : memref<1x2x8xf32, #tpu.memory_space<vmem>>, vector<1x2x8xf32>,
    %34 = vector.shape_cast %25 : vector<256x8xf32> to vector<1x16x16x8xf32>
    %c0_42 = arith.constant 0 : index
    %c0_43 = arith.constant 0 : index
    %c0_44 = arith.constant 0 : index
    %c0_45 = arith.constant 0 : index
    %35 = vector.load %arg4[%c0_42, %c0_43, %c0_44, %c0_45] : memref<1x16x16x8xf32, #tpu.memory_space<vmem>>, vector<1x16x16x8xf32>
    tpu.vector_store %arg4[%c0_42, %c0_43, %c0_44, %c0_45], %34 {strides = array<i32>} : memref<1x16x16x8xf32, #tpu.memory_space<vmem>>, vector<1x16x16x8xf32>,
    return
  }
  func.func @transform_0(%arg0: i32) -> (i32, i32, i32, i32) {
    %c0_i32 = arith.constant 0 : i32
    %c0_i32_0 = arith.constant 0 : i32
    %c0_i32_1 = arith.constant 0 : i32
    %c0_i32_2 = arith.constant 0 : i32
    return %arg0, %c0_i32, %c0_i32_0, %c0_i32_1 : i32, i32, i32, i32
  }
  func.func @transform_1(%arg0: i32) -> (i32, i32) {
    %c0_i32 = arith.constant 0 : i32
    %c0_i32_0 = arith.constant 0 : i32
    %c0_i32_1 = arith.constant 0 : i32
    return %c0_i32, %c0_i32_0 : i32, i32
  }
  func.func @transform_2(%arg0: i32) -> (i32, i32) {
    %c0_i32 = arith.constant 0 : i32
    %c0_i32_0 = arith.constant 0 : i32
    %c0_i32_1 = arith.constant 0 : i32
    return %c0_i32, %c0_i32_0 : i32, i32
  }
  func.func @transform_3(%arg0: i32) -> (i32, i32, i32, i32) {
    %c0_i32 = arith.constant 0 : i32
    %c0_i32_0 = arith.constant 0 : i32
    %c0_i32_1 = arith.constant 0 : i32
    %c0_i32_2 = arith.constant 0 : i32
    return %arg0, %c0_i32, %c0_i32_0, %c0_i32_1 : i32, i32, i32, i32
  }
  func.func @transform_4(%arg0: i32) -> (i32, i32, i32) {
    %c0_i32 = arith.constant 0 : i32
    %c0_i32_0 = arith.constant 0 : i32
    %c0_i32_1 = arith.constant 0 : i32
    return %arg0, %c0_i32, %c0_i32_0 : i32, i32, i32
  }
}

</mosaic_0001>

<bundles_post_ra>
// kernel: tpu_custom_call.1
= control target key start
LH: loop header
LB: loop body
LE: loop exit
PB: predicated region body
PF: predicated region fallthrough
CT: control target
= control target key end

     0   :  { %10 = vsyncpa [#allocation3], 0  ;;  %s4461_s0 = inlined_call_operand.vmem [shape: f32[2,18,18,4], index: 0, kind: input, shape index: {}]   ;;  %s4462_s1 = inlined_call_operand.vmem [shape: f32[36,8], index: 1, kind: input, shape index: {}]   ;;  %s4463_s2 = inlined_call_operand.vmem [shape: f32[1,8], index: 2, kind: input, shape index: {}]   ;;  %s4464_s3 = inlined_call_operand.vmem [shape: f32[2,16,16,8], index: 3, kind: output, shape index: {0}]   ;;  %s4465_s4 = inlined_call_operand.hbm [shape: f32[2,2,8], index: 4, kind: output, shape index: {1}]  }
   0x1   :  { %12 = vsyncpa [#allocation3 + $0x1], 0  ;;  %s2932_s15 = smov 0   ;;  %s2934_s16 = smov 0  }
   0x2   :  { %s2936_s17 = smov 0   ;;  %s2938_s18 = smov 0  }
   0x3 LB: > { %s2953_s19 = sadd.s32 4294967295, %s2896_s18   ;;  %s2437_s20 = sadd.s32 4294967294, %s2896_s18   ;;  %s2896_s18 = sphi %s2938_s18, %s4595_s18   ;;  %s2892_s17 = sphi %s2936_s17, %s4594_s17   ;;  %s2888_s16 = sphi %s2934_s16, %s4593_s16   ;;  %s2884_s15 = sphi %s2932_s15, %s4592_s15  }
   0x4   : > { %s2957_s21 = sadd.s32 1, %s2896_s18   ;;  %s119_s22 = sadd.s32 1, %s2892_s17 }
   0x5   : > { %s116_s23 = ssub.s32 %s2896_s18, %s2957_s21  ;;  %p129_p0 = scmp.ne.s32.totalorder %s2892_s17, %s2888_s16 }
   0x6   : > { %p117_p1 = scmp.eq.s32.totalorder %s116_s23, 0  ;;  %p130_p2 = scmp.eq.s32.totalorder %s2953_s19, 1 }
   0x7   : > { %p135_p3 = scmp.ne.s32.totalorder %s2888_s16, %s2884_s15  ;;  %p136_p4 = scmp.eq.s32.totalorder %s2437_s20, 1 }
   0x8   : > { %s2968_s24 = scalar_select %p117_p1, %s2892_s17, %s119_s22  }
   0x9   : > { %p2970_p5 = por %p130_p2, %p129_p0  ;;  %p2974_p6 = por %p136_p4, %p135_p3 }
   0xa   : > { %p2440_p7 = scmp.ge.s32.totalorder %s2896_s18, 1  ;;  %p168_p8 = scmp.lt.s32.totalorder %s2896_s18, 3 }
   0xc   : > { %p169_p9 = pnand %p2440_p7, %p168_p8 }
   0xe   : > { %172 = sbr.rel (%p169_p9) target bundleno = 882 (0x372), region = 32 }
  0x13   : > { %p199_p10 = scmp.lt.s32.totalorder %s2953_s19, 1  ;;  %s2898_s6 = smov 4   ;;  %vm1896_vm0 = vcmask 1043456   ;;  %vm1523_vm1 = vcmask 31744   ;;  %vm1556_vm2 = vcmask 64512   ;;  %vm1589_vm3 = vcmask 97280  }
  0x14   : > { %s2899_s7 = smov 8   ;;  %s2900_s8 = smov 12   ;;  %vm1622_vm4 = vcmask 130048   ;;  %vm1655_vm5 = vcmask 162816   ;;  %vm1688_vm6 = vcmask 195584   ;;  %vm1721_vm7 = vcmask 228352  }
  0x15   : > { %s2982_s27 = scalar_select %p199_p10, %s2953_s19, 1  ;;  %vm1754_vm8 = vcmask 261120   ;;  %vm1799_vm9 = vcmask 293888   ;;  %vm2295_vm10 = vcmask 1040384   ;;  %vm2297_vm11 = vcmask 58368  }
  0x16   : > { %s2901_s9 = smov 16   ;;  %s2902_s14 = smov 20  }
  0x17   : > { %s2781_s28 = smul.u32 432, %s2982_s27  ;;  %s2903_s29 = smov 24  }
  0x18   : > { %s2905_s10 = smov 32   ;;  %s2672_s20 = sshll.u32 %s2953_s19, 5 }
  0x19   : > { %s2988_s5 = scalar_lea.vmem %s4461_s0, %s2781_s28  ;;  %s4426_s30 = scalar_lea.hbm %s4465_s4, %s2672_s20 }
  0x1a   : > { %v2991_v0 = vld [vmem:[%s2988_s5 + $0x19] sm:$0xff]  ;;  %v241_v1 = vld [vmem:[%s2988_s5 + $0x1] sm:$0xff]  ;;  %v242_v3 = vld [vmem:[%s2988_s5 + $0x9] sm:$0xff]  ;;  %s2906_s19 = smov [#allocation2]  }
  0x1b   : > { %535 = vrot.lane.b32.xlu1 %v2991_v0, %s2898_s6  ;;  %531 = vrot.lane.b32.xlu0 %v241_v1, %s2898_s6  ;;  %v2998_v2 = vld [vmem:[%s2988_s5 + $0x21] sm:$0xff]  ;;  %v3005_v4 = vld [vmem:[%s2988_s5 + $0x39] sm:$0xff] }
  0x1c   : > { %v3008_v5 = vld [vmem:[%s2988_s5 + $0x31] sm:$0xff]  ;;  %v3018_v7 = vld [vmem:[%s2988_s5 + $0x49] sm:$0xff]  ;;  %v3028_v9 = vld [vmem:[%s2988_s5 + $0x61] sm:$0xff] }
  0x1d   : > { %v3015_v6 = vld [vmem:[%s2988_s5 + $0x51] sm:$0xff]  ;;  %v3025_v8 = vld [vmem:[%s2988_s5 + $0x69] sm:$0xff]  ;;  %v3035_v10 = vld [vmem:[%s2988_s5 + $0x81] sm:$0xff] }
  0x1e   : > { %v3038_v11 = vld [vmem:[%s2988_s5 + $0x79] sm:$0xff]  ;;  %v3048_v13 = vld [vmem:[%s2988_s5 + $0x91] sm:$0xff]  ;;  %v3058_v15 = vld [vmem:[%s2988_s5 + $0xa9] sm:$0xff] }
  0x1f   : > { %537 = vrot.lane.b32.xlu1 %v2998_v2, %s2898_s6  ;;  %533 = vrot.lane.b32.xlu0 %v242_v3, %s2898_s6  ;;  %v3045_v12 = vld [vmem:[%s2988_s5 + $0x99] sm:$0xff]  ;;  %v3055_v14 = vld [vmem:[%s2988_s5 + $0xb1] sm:$0xff] }
  0x20   : > { %v258_v16 = vld [vmem:[%s2988_s5 + $0xc9] sm:$0xff]  ;;  %v3066_v17 = vld [vmem:[%s2988_s5 + $0xc1] sm:$0xff]  ;;  %v259_v19 = vld [vmem:[%s2988_s5 + $0xd9] sm:$0xff] }
  0x21   : > { %v260_v18 = vld [vmem:[%s2988_s5 + $0xe1] sm:$0xff]  ;;  %v262_v20 = vld [vmem:[%s2988_s5 + $0xf9] sm:$0xff]  ;;  %v261_v21 = vld [vmem:[%s2988_s5 + $0xf1] sm:$0xff] }
  0x22   : > { %v264_v22 = vld [vmem:[%s2988_s5 + $0x111] sm:$0xff]  ;;  %v263_v23 = vld [vmem:[%s2988_s5 + $0x109] sm:$0xff]  ;;  %v265_v25 = vld [vmem:[%s2988_s5 + $0x121] sm:$0xff] }
  0x23   : > { %541 = vrot.lane.b32.xlu1 %v3005_v4, %s2898_s6  ;;  %539 = vrot.lane.b32.xlu0 %v3008_v5, %s2898_s6  ;;  %v266_v24 = vld [vmem:[%s2988_s5 + $0x129] sm:$0xff]  ;;  %v268_v26 = vld [vmem:[%s2988_s5 + $0x141] sm:$0xff] }
  0x24   : > { %v267_v27 = vld [vmem:[%s2988_s5 + $0x139] sm:$0xff]  ;;  %v269_v29 = vld [vmem:[%s2988_s5 + $0x151] sm:$0xff]  ;;  %v271_v31 = vld [vmem:[%s2988_s5 + $0x169] sm:$0xff] }
  0x25   : > { %v270_v28 = vld [vmem:[%s2988_s5 + $0x159] sm:$0xff]  ;;  %v272_v30 = vld [vmem:[%s2988_s5 + $0x171] sm:$0xff]  ;;  %v273_v33 = vld [vmem:[%s2988_s5 + $0x2] sm:$0xff] }
  0x26   : > { %v274_v32 = vld [vmem:[%s2988_s5 + $0xa] sm:$0xff]  ;;  %v3104_v34 = vld [vmem:[%s2988_s5 + $0x22] sm:$0xff]  ;;  %v3107_v35 = vld [vmem:[%s2988_s5 + $0x1a] sm:$0xff] }
  0x27   : > { %545 = vrot.lane.b32.xlu1 %v3015_v6, %s2898_s6  ;;  %543 = vrot.lane.b32.xlu0 %v3018_v7, %s2898_s6  ;;  %v3114_v36 = vld [vmem:[%s2988_s5 + $0x3a] sm:$0xff]  ;;  %v3117_v37 = vld [vmem:[%s2988_s5 + $0x32] sm:$0xff] }
  0x28   : > { %v3124_v38 = vld [vmem:[%s2988_s5 + $0x52] sm:$0xff]  ;;  %v3127_v39 = vld [vmem:[%s2988_s5 + $0x4a] sm:$0xff]  ;;  %v3137_v41 = vld [vmem:[%s2988_s5 + $0x62] sm:$0xff] }
  0x29   : > { %v3134_v40 = vld [vmem:[%s2988_s5 + $0x6a] sm:$0xff]  ;;  %v3144_v42 = vld [vmem:[%s2988_s5 + $0x82] sm:$0xff]  ;;  %v3147_v43 = vld [vmem:[%s2988_s5 + $0x7a] sm:$0xff] }
  0x2a   : > { %v3154_v44 = vld [vmem:[%s2988_s5 + $0x9a] sm:$0xff]  ;;  %v3157_v45 = vld [vmem:[%s2988_s5 + $0x92] sm:$0xff]  ;;  %v3167_v47 = vld [vmem:[%s2988_s5 + $0xaa] sm:$0xff] }
  0x2b   : > { %549 = vrot.lane.b32.xlu1 %v3025_v8, %s2898_s6  ;;  %547 = vrot.lane.b32.xlu0 %v3028_v9, %s2898_s6  ;;  %v3164_v46 = vld [vmem:[%s2988_s5 + $0xb2] sm:$0xff]  ;;  %v3174_v48 = vld [vmem:[%s2988_s5 + $0xca] sm:$0xff] }
  0x2c   : > { %v3177_v49 = vld [vmem:[%s2988_s5 + $0xc2] sm:$0xff]  ;;  %v3185_v51 = vld [vmem:[%s2988_s5 + $0xda] sm:$0xff]  ;;  %v293_v53 = vld [vmem:[%s2988_s5 + $0xf2] sm:$0xff] }
  0x2d   : > { %v292_v50 = vld [vmem:[%s2988_s5 + $0xe2] sm:$0xff]  ;;  %v294_v52 = vld [vmem:[%s2988_s5 + $0xfa] sm:$0xff]  ;;  %v296_v54 = vld [vmem:[%s2988_s5 + $0x112] sm:$0xff] }
  0x2e   : > { %v295_v55 = vld [vmem:[%s2988_s5 + $0x10a] sm:$0xff]  ;;  %v297_v57 = vld [vmem:[%s2988_s5 + $0x122] sm:$0xff]  ;;  %v299_v59 = vld [vmem:[%s2988_s5 + $0x13a] sm:$0xff] }
  0x2f   : > { %553 = vrot.lane.b32.xlu1 %v3035_v10, %s2898_s6  ;;  %551 = vrot.lane.b32.xlu0 %v3038_v11, %s2898_s6  ;;  %v298_v56 = vld [vmem:[%s2988_s5 + $0x12a] sm:$0xff]  ;;  %v300_v58 = vld [vmem:[%s2988_s5 + $0x142] sm:$0xff] }
  0x30   : > { %v302_v62 = vld [vmem:[%s2988_s5 + $0x15a] sm:$0xff]  ;;  %v301_v63 = vld [vmem:[%s2988_s5 + $0x152] sm:$0xff] }
  0x33   : > { %557 = vrot.lane.b32.xlu1 %v3045_v12, %s2898_s6  ;;  %555 = vrot.lane.b32.xlu0 %v3048_v13, %s2898_s6 }
  0x37   : > { %561 = vrot.lane.b32.xlu1 %v3055_v14, %s2898_s6  ;;  %559 = vrot.lane.b32.xlu0 %v3058_v15, %s2898_s6 }
  0x3b   : > { %565 = vrot.lane.b32.xlu1 %v258_v16, %s2898_s6  ;;  %563 = vrot.lane.b32.xlu0 %v3066_v17, %s2898_s6  ;;  %v304_v16 = vld [vmem:[%s2988_s5 + $0x172] sm:$0xff] }
  0x3f   : > { %569 = vrot.lane.b32.xlu1 %v260_v18, %s2898_s6  ;;  %567 = vrot.lane.b32.xlu0 %v259_v19, %s2898_s6  ;;  %v303_v18 = vld [vmem:[%s2988_s5 + $0x16a] sm:$0xff] }
  0x43   : > { %573 = vrot.lane.b32.xlu1 %v262_v20, %s2898_s6  ;;  %571 = vrot.lane.b32.xlu0 %v261_v21, %s2898_s6 }
  0x47   : > { %577 = vrot.lane.b32.xlu1 %v264_v22, %s2898_s6  ;;  %575 = vrot.lane.b32.xlu0 %v263_v23, %s2898_s6  ;;  %v3231_v23 = vld [vmem:[%s2988_s5 + $0x18] sm:$0xff] }
  0x4b   : > { %581 = vrot.lane.b32.xlu1 %v266_v24, %s2898_s6  ;;  %579 = vrot.lane.b32.xlu0 %v265_v25, %s2898_s6  ;;  %v3234_v24 = vld [vmem:[%s2988_s5 + $0x20] sm:$0xff] }
  0x4f   : > { %585 = vrot.lane.b32.xlu1 %v268_v26, %s2898_s6  ;;  %583 = vrot.lane.b32.xlu0 %v267_v27, %s2898_s6  ;;  %v3245_v27 = vld [vmem:[%s2988_s5 + $0x38] sm:$0xff] }
  0x53   : > { %589 = vrot.lane.b32.xlu1 %v270_v28, %s2898_s6  ;;  %587 = vrot.lane.b32.xlu0 %v269_v29, %s2898_s6  ;;  %v3248_v28 = vld [vmem:[%s2988_s5 + $0x30] sm:$0xff] }
  0x57   : > { %593 = vrot.lane.b32.xlu1 %v272_v30, %s2898_s6  ;;  %591 = vrot.lane.b32.xlu0 %v271_v31, %s2898_s6  ;;  %v3259_v31 = vld [vmem:[%s2988_s5 + $0x50] sm:$0xff] }
  0x5b   : > { %661 = vrot.lane.b32.xlu1 %v274_v32, %s2899_s7  ;;  %659 = vrot.lane.b32.xlu0 %v273_v33, %s2899_s7  ;;  %v3262_v32 = vld [vmem:[%s2988_s5 + $0x48] sm:$0xff] }
  0x5f   : > { %665 = vrot.lane.b32.xlu1 %v3104_v34, %s2899_s7  ;;  %663 = vrot.lane.b32.xlu0 %v3107_v35, %s2899_s7 }
  0x63   : > { %669 = vrot.lane.b32.xlu1 %v3114_v36, %s2899_s7  ;;  %667 = vrot.lane.b32.xlu0 %v3117_v37, %s2899_s7 }
  0x67   : > { %673 = vrot.lane.b32.xlu1 %v3124_v38, %s2899_s7  ;;  %671 = vrot.lane.b32.xlu0 %v3127_v39, %s2899_s7 }
  0x6b   : > { %677 = vrot.lane.b32.xlu1 %v3134_v40, %s2899_s7  ;;  %675 = vrot.lane.b32.xlu0 %v3137_v41, %s2899_s7 }
  0x6f   : > { %681 = vrot.lane.b32.xlu1 %v3144_v42, %s2899_s7  ;;  %679 = vrot.lane.b32.xlu0 %v3147_v43, %s2899_s7 }
  0x73   : > { %685 = vrot.lane.b32.xlu1 %v3154_v44, %s2899_s7  ;;  %683 = vrot.lane.b32.xlu0 %v3157_v45, %s2899_s7 }
  0x77   : > { %689 = vrot.lane.b32.xlu1 %v3164_v46, %s2899_s7  ;;  %687 = vrot.lane.b32.xlu0 %v3167_v47, %s2899_s7 }
  0x7b   : > { %693 = vrot.lane.b32.xlu1 %v3174_v48, %s2899_s7  ;;  %691 = vrot.lane.b32.xlu0 %v3177_v49, %s2899_s7 }
  0x7f   : > { %697 = vrot.lane.b32.xlu1 %v292_v50, %s2899_s7  ;;  %695 = vrot.lane.b32.xlu0 %v3185_v51, %s2899_s7 }
  0x83   : > { %701 = vrot.lane.b32.xlu1 %v294_v52, %s2899_s7  ;;  %699 = vrot.lane.b32.xlu0 %v293_v53, %s2899_s7  ;;  %v3273_v52 = vld [vmem:[%s2988_s5 + $0x68] sm:$0xff]  ;;  %v3276_v53 = vld [vmem:[%s2988_s5 + $0x60] sm:$0xff] }
  0x87   : > { %705 = vrot.lane.b32.xlu1 %v296_v54, %s2899_s7  ;;  %703 = vrot.lane.b32.xlu0 %v295_v55, %s2899_s7 }
  0x8b   : > { %709 = vrot.lane.b32.xlu1 %v298_v56, %s2899_s7  ;;  %707 = vrot.lane.b32.xlu0 %v297_v57, %s2899_s7  ;;  %v3287_v56 = vld [vmem:[%s2988_s5 + $0x80] sm:$0xff]  ;;  %v3290_v57 = vld [vmem:[%s2988_s5 + $0x78] sm:$0xff] }
  0x8d   : > { %v3204_v60 = vpop.permute.xlu1 %535  ;;  %v3206_v61 = vpop.permute.xlu0 %531 }
  0x8f   : > { %713 = vrot.lane.b32.xlu1 %v300_v58, %s2899_s7  ;;  %711 = vrot.lane.b32.xlu0 %v299_v59, %s2899_s7 }
  0x91   : > { %v3212_v1 = vpop.permute.xlu1 %537  ;;  %v3214_v3 = vpop.permute.xlu0 %533 }
  0x93   : > { %717 = vrot.lane.b32.xlu1 %v302_v62, %s2899_s7  ;;  %715 = vrot.lane.b32.xlu0 %v301_v63, %s2899_s7  ;;  %v3301_v62 = vld [vmem:[%s2988_s5 + $0x98] sm:$0xff]  ;;  %v3304_v63 = vld [vmem:[%s2988_s5 + $0x90] sm:$0xff] }
  0x94   : > { %4483 = vst [vmem:[#allocation16_spill] sm:$0xff] %v3301_v62 }
  0x95   : > { %v3220_v19 = vpop.permute.xlu1 %541  ;;  %v3222_v20 = vpop.permute.xlu0 %539 }
  0x97   : > { %721 = vrot.lane.b32.xlu1 %v304_v16, %s2899_s7  ;;  %719 = vrot.lane.b32.xlu0 %v303_v18, %s2899_s7  ;;  %s2904_s7 = smov 28  }
  0x99   : > { %v3226_v21 = vpop.permute.xlu1 %545  ;;  %v3228_v22 = vpop.permute.xlu0 %543 }
  0x9a   : > { %4472 = vst [vmem:[#allocation5_spill] sm:$0xff] %v3226_v21  ;;  %v3371_v21 = vld [vmem:[%s2988_s5 + $0x108] sm:$0xff] }
  0x9b   : > { %789 = vrot.lane.b32.xlu1 %v3234_v24, %s2900_s8  ;;  %787 = vrot.lane.b32.xlu0 %v3231_v23, %s2900_s8  ;;  %4496 = vst [vmem:[#allocation29_spill] sm:$0xff] %v3371_v21 }
  0x9d   : > { %v3240_v25 = vpop.permute.xlu1 %549  ;;  %v3242_v26 = vpop.permute.xlu0 %547 }
  0x9e   : > { %4473 = vst [vmem:[#allocation6_spill] sm:$0xff] %v3240_v25  ;;  %4474 = vst [vmem:[#allocation7_spill] sm:$0xff] %v3242_v26  ;;  %v3357_v25 = vld [vmem:[%s2988_s5 + $0xf8] sm:$0xff]  ;;  %v3360_v26 = vld [vmem:[%s2988_s5 + $0xf0] sm:$0xff] }
  0x9f   : > { %793 = vrot.lane.b32.xlu1 %v3245_v27, %s2900_s8  ;;  %791 = vrot.lane.b32.xlu0 %v3248_v28, %s2900_s8 }
  0xa1   : > { %v3254_v29 = vpop.permute.xlu1 %553  ;;  %v3256_v30 = vpop.permute.xlu0 %551 }
  0xa2   : > { %4475 = vst [vmem:[#allocation8_spill] sm:$0xff] %v3254_v29  ;;  %4476 = vst [vmem:[#allocation9_spill] sm:$0xff] %v3256_v30  ;;  %v3343_v29 = vld [vmem:[%s2988_s5 + $0xe0] sm:$0xff] }
  0xa3   : > { %797 = vrot.lane.b32.xlu1 %v3259_v31, %s2900_s8  ;;  %795 = vrot.lane.b32.xlu0 %v3262_v32, %s2900_s8 }
  0xa5   : > { %v3268_v33 = vpop.permute.xlu1 %557  ;;  %v3270_v50 = vpop.permute.xlu0 %555 }
  0xa6   : > { %4477 = vst [vmem:[#allocation10_spill] sm:$0xff] %v3268_v33  ;;  %4478 = vst [vmem:[#allocation11_spill] sm:$0xff] %v3270_v50  ;;  %v3329_v33 = vld [vmem:[%s2988_s5 + $0xc8] sm:$0xff] }
  0xa7   : > { %801 = vrot.lane.b32.xlu1 %v3273_v52, %s2900_s8  ;;  %799 = vrot.lane.b32.xlu0 %v3276_v53, %s2900_s8 }
  0xa9   : > { %v3282_v54 = vpop.permute.xlu1 %561  ;;  %v3284_v55 = vpop.permute.xlu0 %559 }
  0xaa   : > { %4479 = vst [vmem:[#allocation12_spill] sm:$0xff] %v3282_v54  ;;  %4480 = vst [vmem:[#allocation13_spill] sm:$0xff] %v3284_v55  ;;  %v3315_v54 = vld [vmem:[%s2988_s5 + $0xb0] sm:$0xff] }
  0xab   : > { %805 = vrot.lane.b32.xlu1 %v3287_v56, %s2900_s8  ;;  %803 = vrot.lane.b32.xlu0 %v3290_v57, %s2900_s8  ;;  %4486 = vst [vmem:[#allocation19_spill] sm:$0xff] %v3315_v54 }
  0xad   : > { %v3296_v58 = vpop.permute.xlu1 %565  ;;  %v3298_v59 = vpop.permute.xlu0 %563 }
  0xae   : > { %4481 = vst [vmem:[#allocation14_spill] sm:$0xff] %v3296_v58  ;;  %4482 = vst [vmem:[#allocation15_spill] sm:$0xff] %v3298_v59  ;;  %v3318_v58 = vld [vmem:[%s2988_s5 + $0xa8] sm:$0xff] }
  0xaf   : > { %809 = vrot.lane.b32.xlu1 %v3301_v62, %s2900_s8  ;;  %807 = vrot.lane.b32.xlu0 %v3304_v63, %s2900_s8  ;;  %4487 = vst [vmem:[#allocation20_spill] sm:$0xff] %v3318_v58 }
  0xb1   : > { %v3310_v16 = vpop.permute.xlu1 %569  ;;  %v3312_v18 = vpop.permute.xlu0 %567 }
  0xb2   : > { %4484 = vst [vmem:[#allocation17_spill] sm:$0xff] %v3310_v16  ;;  %4485 = vst [vmem:[#allocation18_spill] sm:$0xff] %v3312_v18  ;;  %v3332_v16 = vld [vmem:[%s2988_s5 + $0xc0] sm:$0xff] }
  0xb3   : > { %813 = vrot.lane.b32.xlu1 %v3315_v54, %s2900_s8  ;;  %811 = vrot.lane.b32.xlu0 %v3318_v58, %s2900_s8 }
  0xb5   : > { %v3324_v59 = vpop.permute.xlu1 %573  ;;  %v3326_v55 = vpop.permute.xlu0 %571 }
  0xb6   : > { %4488 = vst [vmem:[#allocation21_spill] sm:$0xff] %v3324_v59  ;;  %4489 = vst [vmem:[#allocation22_spill] sm:$0xff] %v3326_v55  ;;  %v3346_v59 = vld [vmem:[%s2988_s5 + $0xd8] sm:$0xff] }
  0xb7   : > { %817 = vrot.lane.b32.xlu1 %v3329_v33, %s2900_s8  ;;  %815 = vrot.lane.b32.xlu0 %v3332_v16, %s2900_s8 }
  0xb9   : > { %v3338_v18 = vpop.permute.xlu1 %577  ;;  %v3340_v50 = vpop.permute.xlu0 %575 }
  0xba   : > { %4490 = vst [vmem:[#allocation23_spill] sm:$0xff] %v3338_v18  ;;  %4491 = vst [vmem:[#allocation24_spill] sm:$0xff] %v3340_v50 }
  0xbb   : > { %821 = vrot.lane.b32.xlu1 %v3343_v29, %s2900_s8  ;;  %819 = vrot.lane.b32.xlu0 %v3346_v59, %s2900_s8 }
  0xbd   : > { %v3352_v55 = vpop.permute.xlu1 %581  ;;  %v3354_v30 = vpop.permute.xlu0 %579 }
  0xbe   : > { %4492 = vst [vmem:[#allocation25_spill] sm:$0xff] %v3352_v55  ;;  %4493 = vst [vmem:[#allocation26_spill] sm:$0xff] %v3354_v30  ;;  %v1791_v55 = vld [vmem:[%s4462_s1 + $0x20] sm:$0xf] }
  0xbf   : > { %825 = vrot.lane.b32.xlu1 %v3357_v25, %s2900_s8  ;;  %823 = vrot.lane.b32.xlu0 %v3360_v26, %s2900_s8 }
  0xc0   : > { %2713 = vmatprep.subr.msk.mxu0 %vm1896_vm0, %v1791_v55  ;;  %2771 = vmatprep.subr.msk.mxu1 %vm1896_vm0, %v1791_v55 }
  0xc1   : > { %v3366_v18 = vpop.permute.xlu1 %585  ;;  %v3368_v50 = vpop.permute.xlu0 %583  ;;  %2714 = vmatpush3.msk.msra.mxu0 %vm1896_vm0, %v1791_v55  ;;  %2776 = vmatpush3.msk.msra.mxu1 %vm1896_vm0, %v1791_v55 }
  0xc2   : > { %4494 = vst [vmem:[#allocation27_spill] sm:$0xff] %v3366_v18  ;;  %4495 = vst [vmem:[#allocation28_spill] sm:$0xff] %v3368_v50  ;;  %v1789_v50 = vld [vmem:[%s4462_s1 + $0x10] sm:$0xff] }
  0xc3   : > { %915 = vrot.lane.b32.xlu1 %v2991_v0, %s2901_s9  ;;  %827 = vrot.lane.b32.xlu0 %v3371_v21, %s2900_s8  ;;  %v1790_v0 = vld [vmem:[%s4462_s1 + $0x18] sm:$0xff] }
  0xc4   : > { %2715 = vmatprep.subr.mxu0 %v1790_v0  ;;  %2772 = vmatprep.subr.mxu1 %v1790_v0 }
  0xc5   : > { %v3380_v30 = vpop.permute.xlu1 %589  ;;  %v3382_v18 = vpop.permute.xlu0 %587  ;;  %2716 = vmatpush3.msra.mxu0 %v1790_v0  ;;  %2777 = vmatpush3.msra.mxu1 %v1790_v0  ;;  %v1787_v0 = vld [vmem:[%s4462_s1] sm:$0xff] }
  0xc6   : > { %4497 = vst [vmem:[#allocation30_spill] sm:$0xff] %v3380_v30  ;;  %4498 = vst [vmem:[#allocation31_spill] sm:$0xff] %v3382_v18  ;;  %2717 = vmatprep.subr.mxu0 %v1789_v50  ;;  %2773 = vmatprep.subr.mxu1 %v1789_v50 }
  0xc7   : > { %1043 = vrot.lane.b32.xlu1 %v3107_v35, %s2902_s14  ;;  %917 = vrot.lane.b32.xlu0 %v2998_v2, %s2901_s9  ;;  %v1788_v35 = vld [vmem:[%s4462_s1 + $0x8] sm:$0xff] }
  0xc8   : > { %2718 = vmatpush3.msra.mxu0 %v1789_v50  ;;  %2778 = vmatpush3.msra.mxu1 %v1789_v50 }
  0xc9   : > { %v3394_v30 = vpop.permute.xlu1 %593  ;;  %v3396_v55 = vpop.permute.xlu0 %591  ;;  %2719 = vmatprep.subr.mxu0 %v1788_v35  ;;  %2774 = vmatprep.subr.mxu1 %v1788_v35 }
  0xca   : > { %4499 = vst [vmem:[#allocation32_spill] sm:$0xff] %v3394_v30  ;;  %4500 = vst [vmem:[#allocation33_spill] sm:$0xff] %v3396_v55  ;;  %2720 = vmatpush3.msra.mxu0 %v1788_v35  ;;  %2779 = vmatpush3.msra.mxu1 %v1788_v35 }
  0xcb   : > { %1171 = vrot.lane.b32.xlu1 %v3248_v28, %s2903_s29  ;;  %1045 = vrot.lane.b32.xlu0 %v3104_v34, %s2902_s14 }
  0xcc   : > { %2721 = vmatprep.subr.mxu0 %v1787_v0  ;;  %2775 = vmatprep.subr.mxu1 %v1787_v0 }
  0xcd   : > { %v3405_v2 = vpop.permute.xlu1 %661  ;;  %v3407_v55 = vpop.permute.xlu0 %659  ;;  %2722 = vmatpush3.msra.mxu0 %v1787_v0  ;;  %2780 = vmatpush3.msra.mxu1 %v1787_v0 }
  0xcf   : > { %1299 = vrot.lane.b32.xlu1 %v3008_v5, %s2904_s7  ;;  %1173 = vrot.lane.b32.xlu0 %v3245_v27, %s2903_s29 }
  0xd1   : > { %v3416_v34 = vpop.permute.xlu1 %665  ;;  %v3418_v50 = vpop.permute.xlu0 %663 }
  0xd3   : > { %1301 = vrot.lane.b32.xlu1 %v3005_v4, %s2904_s7  ;;  %919 = vrot.lane.b32.xlu0 %v3008_v5, %s2901_s9 }
  0xd5   : > { %v3424_v35 = vpop.permute.xlu1 %669  ;;  %v3426_v30 = vpop.permute.xlu0 %667 }
  0xd7   : > { %921 = vrot.lane.b32.xlu1 %v3005_v4, %s2901_s9  ;;  %1427 = vrot.lane.b32.xlu0 %v3117_v37, %s2905_s10 }
  0xd9   : > { %v3432_v18 = vpop.permute.xlu1 %673  ;;  %v3434_v0 = vpop.permute.xlu0 %671 }
  0xda   : > { %4501 = vst [vmem:[#allocation34_spill] sm:$0xff] %v3432_v18 }
  0xdb   : > { %1429 = vrot.lane.b32.xlu1 %v3114_v36, %s2905_s10  ;;  %1047 = vrot.lane.b32.xlu0 %v3117_v37, %s2902_s14 }
  0xdd   : > { %v3440_v5 = vpop.permute.xlu1 %677  ;;  %v3442_v21 = vpop.permute.xlu0 %675 }
  0xde   : > { %4502 = vst [vmem:[#allocation35_spill] sm:$0xff] %v3440_v5 }
  0xdf   : > { %1175 = vrot.lane.b32.xlu1 %v3262_v32, %s2903_s29  ;;  %1049 = vrot.lane.b32.xlu0 %v3114_v36, %s2902_s14 }
  0xe1   : > { %v3448_v4 = vpop.permute.xlu1 %681  ;;  %v3450_v18 = vpop.permute.xlu0 %679 }
  0xe2   : > { %4503 = vst [vmem:[#allocation36_spill] sm:$0xff] %v3448_v4  ;;  %4504 = vst [vmem:[#allocation37_spill] sm:$0xff] %v3450_v18 }
  0xe3   : > { %1303 = vrot.lane.b32.xlu1 %v3018_v7, %s2904_s7  ;;  %1177 = vrot.lane.b32.xlu0 %v3259_v31, %s2903_s29 }
  0xe5   : > { %v3456_v37 = vpop.permute.xlu1 %685  ;;  %v3458_v5 = vpop.permute.xlu0 %683 }
  0xe6   : > { %4505 = vst [vmem:[#allocation38_spill] sm:$0xff] %v3456_v37 }
  0xe7   : > { %1305 = vrot.lane.b32.xlu1 %v3015_v6, %s2904_s7  ;;  %923 = vrot.lane.b32.xlu0 %v3018_v7, %s2901_s9 }
  0xe9   : > { %v3464_v36 = vpop.permute.xlu1 %689  ;;  %v3466_v4 = vpop.permute.xlu0 %687 }
  0xea   : > { %4506 = vst [vmem:[#allocation39_spill] sm:$0xff] %v3464_v36  ;;  %4507 = vst [vmem:[#allocation40_spill] sm:$0xff] %v3466_v4 }
  0xeb   : > { %925 = vrot.lane.b32.xlu1 %v3015_v6, %s2901_s9  ;;  %1431 = vrot.lane.b32.xlu0 %v3127_v39, %s2905_s10 }
  0xed   : > { %v3472_v18 = vpop.permute.xlu1 %693  ;;  %v3474_v37 = vpop.permute.xlu0 %691 }
  0xee   : > { %4508 = vst [vmem:[#allocation41_spill] sm:$0xff] %v3472_v18  ;;  %4509 = vst [vmem:[#allocation42_spill] sm:$0xff] %v3474_v37 }
  0xef   : > { %1433 = vrot.lane.b32.xlu1 %v3124_v38, %s2905_s10  ;;  %1051 = vrot.lane.b32.xlu0 %v3127_v39, %s2902_s14 }
  0xf1   : > { %v3480_v7 = vpop.permute.xlu1 %697  ;;  %v3482_v36 = vpop.permute.xlu0 %695 }
  0xf2   : > { %4510 = vst [vmem:[#allocation43_spill] sm:$0xff] %v3480_v7  ;;  %4511 = vst [vmem:[#allocation44_spill] sm:$0xff] %v3482_v36 }
  0xf3   : > { %1179 = vrot.lane.b32.xlu1 %v3276_v53, %s2903_s29  ;;  %1053 = vrot.lane.b32.xlu0 %v3124_v38, %s2902_s14 }
  0xf5   : > { %v3488_v6 = vpop.permute.xlu1 %701  ;;  %v3490_v18 = vpop.permute.xlu0 %699 }
  0xf6   : > { %4512 = vst [vmem:[#allocation45_spill] sm:$0xff] %v3488_v6  ;;  %4513 = vst [vmem:[#allocation46_spill] sm:$0xff] %v3490_v18 }
  0xf7   : > { %1307 = vrot.lane.b32.xlu1 %v3028_v9, %s2904_s7  ;;  %1181 = vrot.lane.b32.xlu0 %v3273_v52, %s2903_s29 }
  0xf9   : > { %v3496_v39 = vpop.permute.xlu1 %705  ;;  %v3498_v7 = vpop.permute.xlu0 %703 }
  0xfa   : > { %4514 = vst [vmem:[#allocation47_spill] sm:$0xff] %v3496_v39  ;;  %4515 = vst [vmem:[#allocation48_spill] sm:$0xff] %v3498_v7 }
  0xfb   : > { %1309 = vrot.lane.b32.xlu1 %v3025_v8, %s2904_s7  ;;  %927 = vrot.lane.b32.xlu0 %v3028_v9, %s2901_s9 }
  0xfd   : > { %v3504_v38 = vpop.permute.xlu1 %709  ;;  %v3506_v6 = vpop.permute.xlu0 %707 }
  0xfe   : > { %4516 = vst [vmem:[#allocation49_spill] sm:$0xff] %v3504_v38  ;;  %4517 = vst [vmem:[#allocation50_spill] sm:$0xff] %v3506_v6 }
  0xff   : > { %929 = vrot.lane.b32.xlu1 %v3025_v8, %s2901_s9  ;;  %1435 = vrot.lane.b32.xlu0 %v3137_v41, %s2905_s10 }
 0x101   : > { %v3512_v18 = vpop.permute.xlu1 %713  ;;  %v3514_v39 = vpop.permute.xlu0 %711 }
 0x102   : > { %4518 = vst [vmem:[#allocation51_spill] sm:$0xff] %v3512_v18  ;;  %4519 = vst [vmem:[#allocation52_spill] sm:$0xff] %v3514_v39 }
 0x103   : > { %1437 = vrot.lane.b32.xlu1 %v3134_v40, %s2905_s10  ;;  %1055 = vrot.lane.b32.xlu0 %v3137_v41, %s2902_s14 }
 0x105   : > { %v3520_v9 = vpop.permute.xlu1 %717  ;;  %v3522_v38 = vpop.permute.xlu0 %715 }
 0x106   : > { %4520 = vst [vmem:[#allocation53_spill] sm:$0xff] %v3520_v9  ;;  %4521 = vst [vmem:[#allocation54_spill] sm:$0xff] %v3522_v38 }
 0x107   : > { %1183 = vrot.lane.b32.xlu1 %v3290_v57, %s2903_s29  ;;  %1057 = vrot.lane.b32.xlu0 %v3134_v40, %s2902_s14 }
 0x109   : > { %v3528_v8 = vpop.permute.xlu1 %721  ;;  %v3530_v18 = vpop.permute.xlu0 %719 }
 0x10a   : > { %4522 = vst [vmem:[#allocation55_spill] sm:$0xff] %v3528_v8  ;;  %4523 = vst [vmem:[#allocation56_spill] sm:$0xff] %v3530_v18 }
 0x10b   : > { %1311 = vrot.lane.b32.xlu1 %v3038_v11, %s2904_s7  ;;  %1185 = vrot.lane.b32.xlu0 %v3287_v56, %s2903_s29 }
 0x10d   : > { %v3536_v41 = vpop.permute.xlu1 %789  ;;  %v3538_v9 = vpop.permute.xlu0 %787 }
 0x10f   : > { %1313 = vrot.lane.b32.xlu1 %v3035_v10, %s2904_s7  ;;  %931 = vrot.lane.b32.xlu0 %v3038_v11, %s2901_s9 }
 0x111   : > { %v3544_v40 = vpop.permute.xlu1 %793  ;;  %v3546_v8 = vpop.permute.xlu0 %791 }
 0x113   : > { %933 = vrot.lane.b32.xlu1 %v3035_v10, %s2901_s9  ;;  %1439 = vrot.lane.b32.xlu0 %v3147_v43, %s2905_s10 }
 0x115   : > { %v3552_v18 = vpop.permute.xlu1 %797  ;;  %v3554_v38 = vpop.permute.xlu0 %795 }
 0x117   : > { %1441 = vrot.lane.b32.xlu1 %v3144_v42, %s2905_s10  ;;  %1059 = vrot.lane.b32.xlu0 %v3147_v43, %s2902_s14 }
 0x119   : > { %v3560_v11 = vpop.permute.xlu1 %801  ;;  %v3562_v39 = vpop.permute.xlu0 %799 }
 0x11b   : > { %1187 = vrot.lane.b32.xlu1 %v3304_v63, %s2903_s29  ;;  %1061 = vrot.lane.b32.xlu0 %v3144_v42, %s2902_s14 }
 0x11d   : > { %v3568_v10 = vpop.permute.xlu1 %805  ;;  %v3570_v6 = vpop.permute.xlu0 %803 }
 0x11f   : > { %1315 = vrot.lane.b32.xlu1 %v3048_v13, %s2904_s7  ;;  %1189 = vrot.lane.b32.xlu0 %v3301_v62, %s2903_s29 }
 0x121   : > { %v3576_v43 = vpop.permute.xlu1 %809  ;;  %v3578_v7 = vpop.permute.xlu0 %807 }
 0x123   : > { %1317 = vrot.lane.b32.xlu1 %v3045_v12, %s2904_s7  ;;  %935 = vrot.lane.b32.xlu0 %v3048_v13, %s2901_s9 }
 0x125   : > { %v3584_v42 = vpop.permute.xlu1 %813  ;;  %v3586_v36 = vpop.permute.xlu0 %811 }
 0x126   : > { %4524 = vst [vmem:[#allocation57_spill] sm:$0xff] %v3584_v42 }
 0x127   : > { %937 = vrot.lane.b32.xlu1 %v3045_v12, %s2901_s9  ;;  %1443 = vrot.lane.b32.xlu0 %v3157_v45, %s2905_s10 }
 0x129   : > { %v3592_v37 = vpop.permute.xlu1 %817  ;;  %v3594_v4 = vpop.permute.xlu0 %815 }
 0x12a   : > { %4525 = vst [vmem:[#allocation58_spill] sm:$0xff] %v3592_v37  ;;  %4526 = vst [vmem:[#allocation59_spill] sm:$0xff] %v3594_v4  ;;  %v210_v4 = vld [vmem:[%s2988_s5 + $0x8] sm:$0xff] }
 0x12b   : > { %1445 = vrot.lane.b32.xlu1 %v3154_v44, %s2905_s10  ;;  %1063 = vrot.lane.b32.xlu0 %v3157_v45, %s2902_s14 }
 0x12d   : > { %v3600_v13 = vpop.permute.xlu1 %821  ;;  %v3602_v42 = vpop.permute.xlu0 %819 }
 0x12e   : > { %4527 = vst [vmem:[#allocation60_spill] sm:$0xff] %v3600_v13  ;;  %4528 = vst [vmem:[#allocation61_spill] sm:$0xff] %v3602_v42 }
 0x12f   : > { %1191 = vrot.lane.b32.xlu1 %v3318_v58, %s2903_s29  ;;  %1065 = vrot.lane.b32.xlu0 %v3154_v44, %s2902_s14 }
 0x131   : > { %v3608_v12 = vpop.permute.xlu1 %825  ;;  %v3610_v37 = vpop.permute.xlu0 %823 }
 0x132   : > { %4529 = vst [vmem:[#allocation62_spill] sm:$0xff] %v3608_v12  ;;  %4530 = vst [vmem:[#allocation63_spill] sm:$0xff] %v3610_v37 }
 0x133   : > { %1319 = vrot.lane.b32.xlu1 %v3058_v15, %s2904_s7  ;;  %1193 = vrot.lane.b32.xlu0 %v3315_v54, %s2903_s29 }
 0x135   : > { %v916_v45 = vpop.permute.xlu1 %915  ;;  %v3616_v13 = vpop.permute.xlu0 %827 }
 0x136   : > { %4531 = vst [vmem:[#allocation64_spill] sm:$0xff] %v3616_v13  ;;  %v209_v13 = vld [vmem:[%s2988_s5] sm:$0xff] }
 0x137   : > { %1321 = vrot.lane.b32.xlu1 %v3055_v14, %s2904_s7  ;;  %939 = vrot.lane.b32.xlu0 %v3058_v15, %s2901_s9 }
 0x139   : > { %v1044_v44 = vpop.permute.xlu1 %1043  ;;  %v918_v12 = vpop.permute.xlu0 %917 }
 0x13b   : > { %941 = vrot.lane.b32.xlu1 %v3055_v14, %s2901_s9  ;;  %1447 = vrot.lane.b32.xlu0 %v3167_v47, %s2905_s10  ;;  %v1524_v14 = vsel %vm1523_vm1, %v209_v13, %v3206_v61 }
 0x13d   : > { %v1172_v37 = vpop.permute.xlu1 %1171  ;;  %v1046_v42 = vpop.permute.xlu0 %1045 }
 0x13f   : > { %1449 = vrot.lane.b32.xlu1 %v3164_v46, %s2905_s10  ;;  %1067 = vrot.lane.b32.xlu0 %v3167_v47, %s2902_s14  ;;  %v1557_v47 = vsel %vm1556_vm2, %v1524_v14, %v3407_v55  ;;  %v2586_v14 = vld [vmem:[%s2988_s5 + $0xc9] sm:$0xff] }
 0x140   : > { %v1590_v58 = vsel %vm1589_vm3, %v1557_v47, %v3538_v9 }
 0x141   : > { %v1300_v15 = vpop.permute.xlu1 %1299  ;;  %v1174_v54 = vpop.permute.xlu0 %1173  ;;  %v1623_v13 = vsel %vm1622_vm4, %v1590_v58, %v916_v45  ;;  %v2491_v58 = vld [vmem:[%s2988_s5 + $0xc1] sm:$0xff] }
 0x143   : > { %1195 = vrot.lane.b32.xlu1 %v3332_v16, %s2903_s29  ;;  %1069 = vrot.lane.b32.xlu0 %v3164_v46, %s2902_s14  ;;  %v1525_v16 = vsel %vm1523_vm1, %v210_v4, %v3214_v3  ;;  %v1656_v46 = vsel %vm1655_vm5, %v1623_v13, %v1044_v44 }
 0x144   : > { %v1558_v55 = vsel %vm1556_vm2, %v1525_v16, %v3405_v2  ;;  %v1689_v9 = vsel %vm1688_vm6, %v1656_v46, %v1172_v37  ;;  %v1526_v16 = vsel %vm1523_vm1, %v3231_v23, %v3204_v60  ;;  %v1527_v60 = vsel %vm1523_vm1, %v3234_v24, %v3212_v1 }
 0x145   : > { %v1302_v62 = vpop.permute.xlu1 %1301  ;;  %v920_v61 = vpop.permute.xlu0 %919  ;;  %v1591_v45 = vsel %vm1589_vm3, %v1558_v55, %v3536_v41  ;;  %v1722_v3 = vsel %vm1721_vm7, %v1689_v9, %v1300_v15  ;;  %v1559_v46 = vsel %vm1556_vm2, %v1526_v16, %v3418_v50  ;;  %v2587_v55 = vld [vmem:[%s2988_s5 + $0xd9] sm:$0xff]  ;;  %v2588_v50 = vld [vmem:[%s2988_s5 + $0xe1] sm:$0xff] }
 0x147   : > { %1323 = vrot.lane.b32.xlu1 %v3066_v17, %s2904_s7  ;;  %1197 = vrot.lane.b32.xlu0 %v3329_v33, %s2903_s29  ;;  %v1624_v17 = vsel %vm1622_vm4, %v1591_v45, %v918_v12 }
 0x148   : > { %v1657_v47 = vsel %vm1655_vm5, %v1624_v17, %v1046_v42 }
 0x149   : > { %v922_v4 = vpop.permute.xlu1 %921  ;;  %v1428_v44 = vpop.permute.xlu0 %1427  ;;  %v1690_v2 = vsel %vm1688_vm6, %v1657_v47, %v1174_v54  ;;  %v2525_v47 = vld [vmem:[%s2988_s5 + $0xda] sm:$0xff] }
 0x14a   : > { %v1755_v33 = vsel %vm1754_vm8, %v1722_v3, %v1428_v44  ;;  %v1723_v37 = vsel %vm1721_vm7, %v1690_v2, %v1302_v62 }
 0x14b   : > { %1325 = vrot.lane.b32.xlu1 %v2586_v14, %s2904_s7  ;;  %943 = vrot.lane.b32.xlu0 %v2491_v58, %s2901_s9 }
 0x14c   : > { %2723 = vmatprep.mubr.msk.f32.mxu0 %vm1799_vm9, %v1755_v33 }
 0x14d   : > { %v1430_v41 = vpop.permute.xlu1 %1429  ;;  %v1048_v15 = vpop.permute.xlu0 %1047 }
 0x14e   : > { %v1756_v13 = vsel %vm1754_vm8, %v1723_v37, %v1430_v41 }
 0x14f   : > { %945 = vrot.lane.b32.xlu1 %v2586_v14, %s2901_s9  ;;  %1451 = vrot.lane.b32.xlu0 %v3177_v49, %s2905_s10 }
 0x150   : > { %2724 = vmatmul.mubr.msk.f32.vlgmr.msra.gmra.mxu0 %vm1799_vm9, %v1756_v13  ;;  %v1528_v13 = vsel %vm1523_vm1, %v3248_v28, %v3222_v20  ;;  %v1529_v20 = vsel %vm1523_vm1, %v3245_v27, %v3220_v19 }
 0x151   : > { %v1176_v42 = vpop.permute.xlu1 %1175  ;;  %v1050_v12 = vpop.permute.xlu0 %1049 }
 0x153   : > { %1453 = vrot.lane.b32.xlu1 %v3174_v48, %s2905_s10  ;;  %1071 = vrot.lane.b32.xlu0 %v3177_v49, %s2902_s14  ;;  %v1592_v49 = vsel %vm1589_vm3, %v1559_v46, %v3546_v8 }
 0x154   : > { %v1625_v58 = vsel %vm1622_vm4, %v1592_v49, %v920_v61 }
 0x155   : > { %v1304_v54 = vpop.permute.xlu1 %1303  ;;  %v1178_v62 = vpop.permute.xlu0 %1177  ;;  %v1658_v23 = vsel %vm1655_vm5, %v1625_v58, %v1048_v15 }
 0x157   : > { %1199 = vrot.lane.b32.xlu1 %v3346_v59, %s2903_s29  ;;  %1073 = vrot.lane.b32.xlu0 %v3174_v48, %s2902_s14  ;;  %v1560_v48 = vsel %vm1556_vm2, %v1527_v60, %v3416_v34  ;;  %v1691_v59 = vsel %vm1688_vm6, %v1658_v23, %v1176_v42  ;;  %v2589_v42 = vld [vmem:[%s2988_s5 + $0xf1] sm:$0xff] }
 0x158   : > { %v1593_v8 = vsel %vm1589_vm3, %v1560_v48, %v3544_v40  ;;  %v1724_v61 = vsel %vm1721_vm7, %v1691_v59, %v1304_v54  ;;  %v2622_v48 = vld [vmem:[%s2988_s5 + $0xfa] sm:$0xff] }
 0x159   : > { %v1306_v9 = vpop.permute.xlu1 %1305  ;;  %v924_v14 = vpop.permute.xlu0 %923  ;;  %v1626_v24 = vsel %vm1622_vm4, %v1593_v8, %v922_v4  ;;  %v2620_v4 = vld [vmem:[%s2988_s5 + $0xe2] sm:$0xff] }
 0x15b   : > { %1327 = vrot.lane.b32.xlu1 %v2587_v55, %s2904_s7  ;;  %1201 = vrot.lane.b32.xlu0 %v3343_v29, %s2903_s29  ;;  %v1659_v29 = vsel %vm1655_vm5, %v1626_v24, %v1050_v12 }
 0x15c   : > { %v1692_v34 = vsel %vm1688_vm6, %v1659_v29, %v1178_v62 }
 0x15d   : > { %v926_v45 = vpop.permute.xlu1 %925  ;;  %v1432_v1 = vpop.permute.xlu0 %1431  ;;  %v1725_v40 = vsel %vm1721_vm7, %v1692_v34, %v1306_v9 }
 0x15e   : > { %v1757_v3 = vsel %vm1754_vm8, %v1724_v61, %v1432_v1  ;;  %v4532_v1 = vld [vmem:[#allocation29_spill] sm:$0xff] }
 0x15f   : > { %1329 = vrot.lane.b32.xlu1 %v2588_v50, %s2904_s7  ;;  %947 = vrot.lane.b32.xlu0 %v2587_v55, %s2901_s9 }
 0x160   : > { %2726 = vmatprep.mubr.msk.f32.mxu0 %vm1799_vm9, %v1757_v3  ;;  %v2591_v3 = vld [vmem:[%s2988_s5 + $0x109] sm:$0xff] }
 0x161   : > { %v1434_v44 = vpop.permute.xlu1 %1433  ;;  %v1052_v17 = vpop.permute.xlu0 %1051 }
 0x162   : > { %v1758_v33 = vsel %vm1754_vm8, %v1725_v40, %v1434_v44  ;;  %v3773_v44 = vld [vmem:[%s2988_s5 + $0x110] sm:$0xff] }
 0x163   : > { %949 = vrot.lane.b32.xlu1 %v2588_v50, %s2901_s9  ;;  %1455 = vrot.lane.b32.xlu0 %v3185_v51, %s2905_s10  ;;  %v1561_v51 = vsel %vm1556_vm2, %v1528_v13, %v3426_v30 }
 0x164   : > { %2727 = vmatmul.mubr.msk.f32.gmra.mxu0 %vm1799_vm9, %v1758_v33  ;;  %v1594_v12 = vsel %vm1589_vm3, %v1561_v51, %v3554_v38  ;;  %v2590_v38 = vld [vmem:[%s2988_s5 + $0xf9] sm:$0xff]  ;;  %v4533_v33 = vld [vmem:[#allocation5_spill] sm:$0xff] }
 0x165   : > { %v1180_v2 = vpop.permute.xlu1 %1179  ;;  %v1054_v37 = vpop.permute.xlu0 %1053  ;;  %v1627_v16 = vsel %vm1622_vm4, %v1594_v12, %v924_v14 }
 0x166   : > { %v1660_v28 = vsel %vm1655_vm5, %v1627_v16, %v1052_v17 }
 0x167   : > { %1457 = vrot.lane.b32.xlu1 %v2620_v4, %s2905_s10  ;;  %1075 = vrot.lane.b32.xlu0 %v2525_v47, %s2902_s14  ;;  %v1693_v30 = vsel %vm1688_vm6, %v1660_v28, %v1180_v2 }
 0x169   : > { %v1308_v41 = vpop.permute.xlu1 %1307  ;;  %v1182_v15 = vpop.permute.xlu0 %1181 }
 0x16a   : > { %v1726_v55 = vsel %vm1721_vm7, %v1693_v30, %v1308_v41 }
 0x16b   : > { %1203 = vrot.lane.b32.xlu1 %v3360_v26, %s2903_s29  ;;  %1077 = vrot.lane.b32.xlu0 %v2620_v4, %s2902_s14  ;;  %v1562_v26 = vsel %vm1556_vm2, %v1529_v20, %v3424_v35 }
 0x16c   : > { %v1595_v46 = vsel %vm1589_vm3, %v1562_v26, %v3552_v18  ;;  %v2621_v18 = vld [vmem:[%s2988_s5 + $0xf2] sm:$0xff] }
 0x16d   : > { %v1310_v54 = vpop.permute.xlu1 %1309  ;;  %v928_v62 = vpop.permute.xlu0 %927  ;;  %v1628_v49 = vsel %vm1622_vm4, %v1595_v46, %v926_v45  ;;  %v1530_v45 = vsel %vm1523_vm1, %v3262_v32, %v3228_v22  ;;  %v1531_v22 = vsel %vm1523_vm1, %v3259_v31, %v4533_v33  ;;  %v2530_v26 = vld [vmem:[%s2988_s5 + $0x112] sm:$0xff] }
 0x16e   : > { %v1563_v24 = vsel %vm1556_vm2, %v1530_v45, %v3434_v0  ;;  %v4534_v0 = vld [vmem:[#allocation34_spill] sm:$0xff]  ;;  %v4535_v46 = vld [vmem:[#allocation7_spill] sm:$0xff] }
 0x16f   : > { %1331 = vrot.lane.b32.xlu1 %v2589_v42, %s2904_s7  ;;  %1205 = vrot.lane.b32.xlu0 %v3357_v25, %s2903_s29  ;;  %v1661_v25 = vsel %vm1655_vm5, %v1628_v49, %v1054_v37  ;;  %v1596_v29 = vsel %vm1589_vm3, %v1563_v24, %v3562_v39  ;;  %v1564_v39 = vsel %vm1556_vm2, %v1531_v22, %v4534_v0  ;;  %v4538_v0 = vld [vmem:[#allocation9_spill] sm:$0xff] }
 0x170   : > { %v1694_v35 = vsel %vm1688_vm6, %v1661_v25, %v1182_v15  ;;  %v1629_v17 = vsel %vm1622_vm4, %v1596_v29, %v928_v62  ;;  %v1597_v47 = vsel %vm1589_vm3, %v1564_v39, %v3560_v11  ;;  %v2623_v11 = vld [vmem:[%s2988_s5 + $0x10a] sm:$0xff]  ;;  %v3817_v25 = vld [vmem:[%s2988_s5 + $0x120] sm:$0xff]  ;;  %v1534_v39 = vsel %vm1523_vm1, %v3290_v57, %v4538_v0 }
 0x171   : > { %v930_v19 = vpop.permute.xlu1 %929  ;;  %v1436_v27 = vpop.permute.xlu0 %1435  ;;  %v1727_v14 = vsel %vm1721_vm7, %v1694_v35, %v1310_v54 }
 0x172   : > { %v1759_v9 = vsel %vm1754_vm8, %v1726_v55, %v1436_v27  ;;  %v1630_v41 = vsel %vm1622_vm4, %v1597_v47, %v930_v19  ;;  %v1532_v55 = vsel %vm1523_vm1, %v3276_v53, %v4535_v46 }
 0x173   : > { %1333 = vrot.lane.b32.xlu1 %v2590_v38, %s2904_s7  ;;  %951 = vrot.lane.b32.xlu0 %v2589_v42, %s2901_s9  ;;  %v2592_v42 = vld [vmem:[%s2988_s5 + $0x111] sm:$0xff]  ;;  %v1565_v19 = vsel %vm1556_vm2, %v1532_v55, %v3442_v21 }
 0x174   : > { %2729 = vmatprep.mubr.msk.f32.mxu0 %vm1799_vm9, %v1759_v9  ;;  %v1598_v27 = vsel %vm1589_vm3, %v1565_v19, %v3570_v6  ;;  %v4537_v21 = vld [vmem:[#allocation35_spill] sm:$0xff] }
 0x175   : > { %v1438_v58 = vpop.permute.xlu1 %1437  ;;  %v1056_v60 = vpop.permute.xlu0 %1055 }
 0x176   : > { %v1760_v23 = vsel %vm1754_vm8, %v1727_v14, %v1438_v58  ;;  %v1662_v32 = vsel %vm1655_vm5, %v1629_v17, %v1056_v60  ;;  %v2593_v60 = vld [vmem:[%s2988_s5 + $0x121] sm:$0xff] }
 0x177   : > { %953 = vrot.lane.b32.xlu1 %v2590_v38, %s2901_s9  ;;  %1459 = vrot.lane.b32.xlu0 %v2621_v18, %s2905_s10 }
 0x178   : > { %2730 = vmatmul.mubr.msk.f32.gmra.mxu0 %vm1799_vm9, %v1760_v23 }
 0x179   : > { %v1184_v59 = vpop.permute.xlu1 %1183  ;;  %v1058_v50 = vpop.permute.xlu0 %1057 }
 0x17a   : > { %v1695_v4 = vsel %vm1688_vm6, %v1662_v32, %v1184_v59  ;;  %v1663_v13 = vsel %vm1655_vm5, %v1630_v41, %v1058_v50  ;;  %v3836_v50 = vld [vmem:[%s2988_s5 + $0x128] sm:$0xff] }
 0x17b   : > { %1461 = vrot.lane.b32.xlu1 %v2622_v48, %s2905_s10  ;;  %1079 = vrot.lane.b32.xlu0 %v2621_v18, %s2902_s14  ;;  %v4536_v18 = vld [vmem:[#allocation6_spill] sm:$0xff] }
 0x17c   : > { %v1533_v53 = vsel %vm1523_vm1, %v3273_v52, %v4536_v18  ;;  %v2596_v18 = vld [vmem:[%s2988_s5 + $0x141] sm:$0xff] }
 0x17d   : > { %v1312_v8 = vpop.permute.xlu1 %1311  ;;  %v1186_v61 = vpop.permute.xlu0 %1185  ;;  %v1566_v6 = vsel %vm1556_vm2, %v1533_v53, %v4537_v21  ;;  %v4542_v21 = vld [vmem:[#allocation11_spill] sm:$0xff] }
 0x17e   : > { %v1728_v2 = vsel %vm1721_vm7, %v1695_v4, %v1312_v8  ;;  %v1696_v51 = vsel %vm1688_vm6, %v1663_v13, %v1186_v61  ;;  %v1599_v23 = vsel %vm1589_vm3, %v1566_v6, %v3568_v10  ;;  %v4539_v4 = vld [vmem:[#allocation37_spill] sm:$0xff]  ;;  %v4540_v13 = vld [vmem:[#allocation8_spill] sm:$0xff]  ;;  %v1536_v6 = vsel %vm1523_vm1, %v3304_v63, %v4542_v21 }
 0x17f   : > { %1207 = vrot.lane.b32.xlu1 %v4532_v1, %s2903_s29  ;;  %1081 = vrot.lane.b32.xlu0 %v2622_v48, %s2902_s14  ;;  %v1567_v47 = vsel %vm1556_vm2, %v1534_v39, %v4539_v4 }
 0x181   : > { %v1314_v34 = vpop.permute.xlu1 %1313  ;;  %v932_v40 = vpop.permute.xlu0 %931 }
 0x182   : > { %v1729_v12 = vsel %vm1721_vm7, %v1696_v51, %v1314_v34  ;;  %v1631_v35 = vsel %vm1622_vm4, %v1598_v27, %v932_v40  ;;  %v2625_v34 = vld [vmem:[%s2988_s5 + $0x122] sm:$0xff]  ;;  %v1535_v51 = vsel %vm1523_vm1, %v3287_v56, %v4540_v13 }
 0x183   : > { %1335 = vrot.lane.b32.xlu1 %v2591_v3, %s2904_s7  ;;  %1209 = vrot.lane.b32.xlu0 %v3773_v44, %s2903_s29  ;;  %v2594_v40 = vld [vmem:[%s2988_s5 + $0x129] sm:$0xff] }
 0x185   : > { %v934_v31 = vpop.permute.xlu1 %933  ;;  %v1440_v37 = vpop.permute.xlu0 %1439 }
 0x186   : > { %v1761_v15 = vsel %vm1754_vm8, %v1728_v2, %v1440_v37  ;;  %v1632_v8 = vsel %vm1622_vm4, %v1599_v23, %v934_v31  ;;  %v2532_v2 = vld [vmem:[%s2988_s5 + $0x12a] sm:$0xff]  ;;  %v1600_v31 = vsel %vm1589_vm3, %v1567_v47, %v3578_v7 }
 0x187   : > { %955 = vrot.lane.b32.xlu1 %v2591_v3, %s2901_s9  ;;  %829 = vrot.lane.b32.xlu0 %v3773_v44, %s2900_s8 }
 0x188   : > { %2732 = vmatprep.mubr.msk.f32.mxu0 %vm1799_vm9, %v1761_v15 }
 0x189   : > { %v1442_v54 = vpop.permute.xlu1 %1441  ;;  %v1060_v62 = vpop.permute.xlu0 %1059 }
 0x18a   : > { %v1762_v16 = vsel %vm1754_vm8, %v1729_v12, %v1442_v54  ;;  %v1664_v14 = vsel %vm1655_vm5, %v1631_v35, %v1060_v62  ;;  %v2469_v12 = vld [vmem:[%s2988_s5 + $0x138] sm:$0xff] }
 0x18b   : > { %1463 = vrot.lane.b32.xlu1 %v2623_v11, %s2905_s10  ;;  %1337 = vrot.lane.b32.xlu0 %v2592_v42, %s2904_s7  ;;  %v2627_v35 = vld [vmem:[%s2988_s5 + $0x13a] sm:$0xff] }
 0x18c   : > { %2733 = vmatmul.mubr.msk.f32.gmra.mxu0 %vm1799_vm9, %v1762_v16 }
 0x18d   : > { %v1188_v20 = vpop.permute.xlu1 %1187  ;;  %v1062_v28 = vpop.permute.xlu0 %1061 }
 0x18e   : > { %v1697_v58 = vsel %vm1688_vm6, %v1664_v14, %v1188_v20  ;;  %v1665_v45 = vsel %vm1655_vm5, %v1632_v8, %v1062_v28  ;;  %v4544_v8 = vld [vmem:[#allocation16_spill] sm:$0xff] }
 0x18f   : > { %1083 = vrot.lane.b32.xlu1 %v2623_v11, %s2902_s14  ;;  %957 = vrot.lane.b32.xlu0 %v2592_v42, %s2901_s9  ;;  %v4541_v11 = vld [vmem:[#allocation36_spill] sm:$0xff] }
 0x190   : > { %v1568_v42 = vsel %vm1556_vm2, %v1535_v51, %v4541_v11  ;;  %v4547_v51 = vld [vmem:[#allocation13_spill] sm:$0xff] }
 0x191   : > { %v1316_v30 = vpop.permute.xlu1 %1315  ;;  %v1190_v38 = vpop.permute.xlu0 %1189  ;;  %v1601_v54 = vsel %vm1589_vm3, %v1568_v42, %v3576_v43  ;;  %v2595_v43 = vld [vmem:[%s2988_s5 + $0x139] sm:$0xff] }
 0x192   : > { %v1730_v48 = vsel %vm1721_vm7, %v1697_v58, %v1316_v30  ;;  %v1698_v10 = vsel %vm1688_vm6, %v1665_v45, %v1190_v38  ;;  %v2564_v38 = vld [vmem:[%s2988_s5 + $0x140] sm:$0xff]  ;;  %v1569_v58 = vsel %vm1556_vm2, %v1536_v6, %v3458_v5  ;;  %v4545_v45 = vld [vmem:[#allocation38_spill] sm:$0xff] }
 0x193   : > { %1085 = vrot.lane.b32.xlu1 %v2530_v26, %s2902_s14  ;;  %1465 = vrot.lane.b32.xlu0 %v2530_v26, %s2905_s10  ;;  %v4549_v42 = vld [vmem:[#allocation40_spill] sm:$0xff] }
 0x195   : > { %v1318_v49 = vpop.permute.xlu1 %1317  ;;  %v936_v9 = vpop.permute.xlu0 %935 }
 0x196   : > { %v1731_v1 = vsel %vm1721_vm7, %v1698_v10, %v1318_v49  ;;  %v1633_v15 = vsel %vm1622_vm4, %v1600_v31, %v936_v9  ;;  %v2534_v10 = vld [vmem:[%s2988_s5 + $0x142] sm:$0xff]  ;;  %v2566_v31 = vld [vmem:[%s2988_s5 + $0x158] sm:$0xff] }
 0x197   : > { %831 = vrot.lane.b32.xlu1 %v3817_v25, %s2900_s8  ;;  %1211 = vrot.lane.b32.xlu0 %v3817_v25, %s2903_s29 }
 0x199   : > { %v938_v52 = vpop.permute.xlu1 %937  ;;  %v1444_v59 = vpop.permute.xlu0 %1443 }
 0x19a   : > { %v1763_v61 = vsel %vm1754_vm8, %v1730_v48, %v1444_v59  ;;  %v1634_v20 = vsel %vm1622_vm4, %v1601_v54, %v938_v52  ;;  %v4543_v59 = vld [vmem:[#allocation10_spill] sm:$0xff]  ;;  %v2598_v54 = vld [vmem:[%s2988_s5 + $0x159] sm:$0xff] }
 0x19b   : > { %1339 = vrot.lane.b32.xlu1 %v2593_v60, %s2904_s7  ;;  %1213 = vrot.lane.b32.xlu0 %v3836_v50, %s2903_s29 }
 0x19c   : > { %2735 = vmatprep.mubr.msk.f32.mxu0 %vm1799_vm9, %v1763_v61  ;;  %v1537_v61 = vsel %vm1523_vm1, %v4544_v8, %v4543_v59  ;;  %v2473_v59 = vld [vmem:[%s2988_s5 + $0x168] sm:$0xff] }
 0x19d   : > { %v1446_v24 = vpop.permute.xlu1 %1445  ;;  %v1064_v3 = vpop.permute.xlu0 %1063  ;;  %v1570_v5 = vsel %vm1556_vm2, %v1537_v61, %v4545_v45  ;;  %v2568_v45 = vld [vmem:[%s2988_s5 + $0x170] sm:$0xff] }
 0x19e   : > { %v1764_v29 = vsel %vm1754_vm8, %v1731_v1, %v1446_v24  ;;  %v1666_v57 = vsel %vm1655_vm5, %v1633_v15, %v1064_v3  ;;  %v4546_v1 = vld [vmem:[#allocation57_spill] sm:$0xff] }
 0x19f   : > { %959 = vrot.lane.b32.xlu1 %v2593_v60, %s2901_s9  ;;  %833 = vrot.lane.b32.xlu0 %v3836_v50, %s2900_s8  ;;  %v1602_v60 = vsel %vm1589_vm3, %v1569_v58, %v3586_v36  ;;  %v1603_v24 = vsel %vm1589_vm3, %v1570_v5, %v4546_v1  ;;  %v2536_v58 = vld [vmem:[%s2988_s5 + $0x15a] sm:$0xff] }
 0x1a0   : > { %2736 = vmatmul.mubr.msk.f32.gmra.mxu0 %vm1799_vm9, %v1764_v29  ;;  %v4555_v1 = vld [vmem:[#allocation15_spill] sm:$0xff] }
 0x1a1   : > { %v1192_v17 = vpop.permute.xlu1 %1191  ;;  %v1066_v33 = vpop.permute.xlu0 %1065 }
 0x1a2   : > { %v1699_v7 = vsel %vm1688_vm6, %v1666_v57, %v1192_v17  ;;  %v1667_v26 = vsel %vm1655_vm5, %v1634_v20, %v1066_v33  ;;  %v4548_v57 = vld [vmem:[#allocation20_spill] sm:$0xff] }
 0x1a3   : > { %1467 = vrot.lane.b32.xlu1 %v2625_v34, %s2905_s10  ;;  %1341 = vrot.lane.b32.xlu0 %v2594_v40, %s2904_s7  ;;  %v1538_v11 = vsel %vm1523_vm1, %v4548_v57, %v4547_v51 }
 0x1a5   : > { %v1320_v22 = vpop.permute.xlu1 %1319  ;;  %v1194_v32 = vpop.permute.xlu0 %1193 }
 0x1a6   : > { %v1732_v62 = vsel %vm1721_vm7, %v1699_v7, %v1320_v22  ;;  %v1700_v30 = vsel %vm1688_vm6, %v1667_v26, %v1194_v32  ;;  %v2471_v32 = vld [vmem:[%s2988_s5 + $0x150] sm:$0xff]  ;;  %v1571_v7 = vsel %vm1556_vm2, %v1538_v11, %v4549_v42  ;;  %v4551_v26 = vld [vmem:[#allocation12_spill] sm:$0xff] }
 0x1a7   : > { %1087 = vrot.lane.b32.xlu1 %v2625_v34, %s2902_s14  ;;  %961 = vrot.lane.b32.xlu0 %v2594_v40, %s2901_s9 }
 0x1a9   : > { %v1322_v37 = vpop.permute.xlu1 %1321  ;;  %v940_v41 = vpop.permute.xlu0 %939 }
 0x1aa   : > { %v1733_v46 = vsel %vm1721_vm7, %v1700_v30, %v1322_v37  ;;  %v1635_v52 = vsel %vm1622_vm4, %v1602_v60, %v940_v41  ;;  %v4552_v30 = vld [vmem:[#allocation19_spill] sm:$0xff] }
 0x1ab   : > { %1089 = vrot.lane.b32.xlu1 %v2532_v2, %s2902_s14  ;;  %1469 = vrot.lane.b32.xlu0 %v2532_v2, %s2905_s10  ;;  %v2597_v2 = vld [vmem:[%s2988_s5 + $0x151] sm:$0xff] }
 0x1ad   : > { %v942_v56 = vpop.permute.xlu1 %941  ;;  %v1448_v16 = vpop.permute.xlu0 %1447 }
 0x1ae   : > { %v1765_v28 = vsel %vm1754_vm8, %v1732_v62, %v1448_v16  ;;  %v1636_v40 = vsel %vm1622_vm4, %v1603_v24, %v942_v56  ;;  %v4550_v62 = vld [vmem:[#allocation59_spill] sm:$0xff] }
 0x1af   : > { %835 = vrot.lane.b32.xlu1 %v2469_v12, %s2900_s8  ;;  %1215 = vrot.lane.b32.xlu0 %v2469_v12, %s2903_s29  ;;  %v2629_v12 = vld [vmem:[%s2988_s5 + $0x152] sm:$0xff]  ;;  %v1604_v56 = vsel %vm1589_vm3, %v1571_v7, %v4550_v62 }
 0x1b0   : > { %2738 = vmatprep.mubr.msk.f32.mxu0 %vm1799_vm9, %v1765_v28 }
 0x1b1   : > { %v1450_v55 = vpop.permute.xlu1 %1449  ;;  %v1068_v19 = vpop.permute.xlu0 %1067 }
 0x1b2   : > { %v1766_v27 = vsel %vm1754_vm8, %v1733_v46, %v1450_v55  ;;  %v1668_v63 = vsel %vm1655_vm5, %v1635_v52, %v1068_v19  ;;  %v4553_v46 = vld [vmem:[#allocation39_spill] sm:$0xff] }
 0x1b3   : > { %1343 = vrot.lane.b32.xlu1 %v2595_v43, %s2904_s7  ;;  %1217 = vrot.lane.b32.xlu0 %v2564_v38, %s2903_s29 }
 0x1b4   : > { %2739 = vmatmul.mubr.msk.f32.gmra.mxu0 %vm1799_vm9, %v1766_v27  ;;  %v4554_v27 = vld [vmem:[#allocation58_spill] sm:$0xff] }
 0x1b5   : > { %v1196_v49 = vpop.permute.xlu1 %1195  ;;  %v1070_v9 = vpop.permute.xlu0 %1069 }
 0x1b6   : > { %v1701_v36 = vsel %vm1688_vm6, %v1668_v63, %v1196_v49  ;;  %v1669_v33 = vsel %vm1655_vm5, %v1636_v40, %v1070_v9  ;;  %v2599_v63 = vld [vmem:[%s2988_s5 + $0x169] sm:$0xff] }
 0x1b7   : > { %963 = vrot.lane.b32.xlu1 %v2595_v43, %s2901_s9  ;;  %837 = vrot.lane.b32.xlu0 %v2564_v38, %s2900_s8  ;;  %v1539_v43 = vsel %vm1523_vm1, %v4552_v30, %v4551_v26 }
 0x1b8   : > { %v1572_v55 = vsel %vm1556_vm2, %v1539_v43, %v4553_v46  ;;  %v2475_v43 = vld [vmem:[%s2988_s5 + $0x180] sm:$0xff] }
 0x1b9   : > { %v1324_v53 = vpop.permute.xlu1 %1323  ;;  %v1198_v14 = vpop.permute.xlu0 %1197  ;;  %v1605_v49 = vsel %vm1589_vm3, %v1572_v55, %v4554_v27  ;;  %v2831_v55 = vld [vmem:[%s2988_s5 + $0xd8] sm:$0xff] }
 0x1ba   : > { %v1734_v3 = vsel %vm1721_vm7, %v1701_v36, %v1324_v53  ;;  %v1702_v22 = vsel %vm1688_vm6, %v1669_v33, %v1198_v14 }
 0x1bb   : > { %1471 = vrot.lane.b32.xlu1 %v2627_v35, %s2905_s10  ;;  %1345 = vrot.lane.b32.xlu0 %v2596_v18, %s2904_s7 }
 0x1bd   : > { %v1326_v23 = vpop.permute.xlu1 %1325  ;;  %v944_v48 = vpop.permute.xlu0 %943 }
 0x1be   : > { %v1735_v0 = vsel %vm1721_vm7, %v1702_v22, %v1326_v23  ;;  %v1637_v28 = vsel %vm1622_vm4, %v1604_v56, %v944_v48 }
 0x1bf   : > { %1091 = vrot.lane.b32.xlu1 %v2627_v35, %s2902_s14  ;;  %965 = vrot.lane.b32.xlu0 %v2596_v18, %s2901_s9 }
 0x1c1   : > { %v946_v29 = vpop.permute.xlu1 %945  ;;  %v1452_v34 = vpop.permute.xlu0 %1451 }
 0x1c2   : > { %v1767_v17 = vsel %vm1754_vm8, %v1734_v3, %v1452_v34  ;;  %v1638_v53 = vsel %vm1622_vm4, %v1605_v49, %v946_v29  ;;  %v4556_v3 = vld [vmem:[#allocation42_spill] sm:$0xff]  ;;  %v4557_v34 = vld [vmem:[#allocation61_spill] sm:$0xff]  ;;  %v4562_v49 = vld [vmem:[#allocation44_spill] sm:$0xff] }
 0x1c3   : > { %1093 = vrot.lane.b32.xlu1 %v2534_v10, %s2902_s14  ;;  %1473 = vrot.lane.b32.xlu0 %v2534_v10, %s2905_s10  ;;  %v2829_v10 = vld [vmem:[%s2988_s5 + $0xc0] sm:$0xff] }
 0x1c4   : > { %2741 = vmatprep.mubr.msk.f32.mxu0 %vm1799_vm9, %v1767_v17  ;;  %v1540_v24 = vsel %vm1523_vm1, %v2829_v10, %v4555_v1  ;;  %v2633_v10 = vld [vmem:[%s2988_s5 + $0x182] sm:$0xff] }
 0x1c5   : > { %v1454_v39 = vpop.permute.xlu1 %1453  ;;  %v1072_v4 = vpop.permute.xlu0 %1071  ;;  %v1573_v29 = vsel %vm1556_vm2, %v1540_v24, %v4556_v3  ;;  %v2602_v1 = vld [vmem:[%s2988_s5 + $0x189] sm:$0xff] }
 0x1c6   : > { %v1768_v47 = vsel %vm1754_vm8, %v1735_v0, %v1454_v39  ;;  %v1670_v38 = vsel %vm1655_vm5, %v1637_v28, %v1072_v4  ;;  %v1606_v40 = vsel %vm1589_vm3, %v1573_v29, %v4557_v34  ;;  %v4558_v0 = vld [vmem:[#allocation14_spill] sm:$0xff] }
 0x1c7   : > { %839 = vrot.lane.b32.xlu1 %v2471_v32, %s2900_s8  ;;  %1219 = vrot.lane.b32.xlu0 %v2471_v32, %s2903_s29  ;;  %v2830_v32 = vld [vmem:[%s2988_s5 + $0xc8] sm:$0xff]  ;;  %v2538_v28 = vld [vmem:[%s2988_s5 + $0x172] sm:$0xff] }
 0x1c8   : > { %2742 = vmatmul.mubr.msk.f32.gmra.mxu0 %vm1799_vm9, %v1768_v47  ;;  %v1541_v39 = vsel %vm1523_vm1, %v2830_v32, %v4558_v0  ;;  %v4559_v47 = vld [vmem:[#allocation41_spill] sm:$0xff]  ;;  %v4566_v24 = vld [vmem:[#allocation62_spill] sm:$0xff] }
 0x1c9   : > { %v1200_v37 = vpop.permute.xlu1 %1199  ;;  %v1074_v41 = vpop.permute.xlu0 %1073 }
 0x1ca   : > { %v1703_v19 = vsel %vm1688_vm6, %v1670_v38, %v1200_v37  ;;  %v1671_v21 = vsel %vm1655_vm5, %v1638_v53, %v1074_v41  ;;  %v2631_v37 = vld [vmem:[%s2988_s5 + $0x16a] sm:$0xff]  ;;  %v4563_v53 = vld [vmem:[#allocation63_spill] sm:$0xff] }
 0x1cb   : > { %1347 = vrot.lane.b32.xlu1 %v2597_v2, %s2904_s7  ;;  %1221 = vrot.lane.b32.xlu0 %v2566_v31, %s2903_s29  ;;  %v2600_v41 = vld [vmem:[%s2988_s5 + $0x171] sm:$0xff] }
 0x1cd   : > { %v1328_v15 = vpop.permute.xlu1 %1327  ;;  %v1202_v13 = vpop.permute.xlu0 %1201 }
 0x1ce   : > { %v1736_v9 = vsel %vm1721_vm7, %v1703_v19, %v1328_v15  ;;  %v1704_v6 = vsel %vm1688_vm6, %v1671_v21, %v1202_v13  ;;  %v4560_v15 = vld [vmem:[#allocation60_spill] sm:$0xff]  ;;  %v4561_v19 = vld [vmem:[#allocation18_spill] sm:$0xff] }
 0x1cf   : > { %967 = vrot.lane.b32.xlu1 %v2597_v2, %s2901_s9  ;;  %841 = vrot.lane.b32.xlu0 %v2566_v31, %s2900_s8  ;;  %v1574_v2 = vsel %vm1556_vm2, %v1541_v39, %v4559_v47  ;;  %v1542_v27 = vsel %vm1523_vm1, %v2831_v55, %v4561_v19 }
 0x1d0   : > { %v1607_v13 = vsel %vm1589_vm3, %v1574_v2, %v4560_v15 }
 0x1d1   : > { %v1330_v16 = vpop.permute.xlu1 %1329  ;;  %v948_v20 = vpop.permute.xlu0 %947 }
 0x1d2   : > { %v1737_v60 = vsel %vm1721_vm7, %v1704_v6, %v1330_v16  ;;  %v1639_v22 = vsel %vm1622_vm4, %v1606_v40, %v948_v20 }
 0x1d3   : > { %1475 = vrot.lane.b32.xlu1 %v2629_v12, %s2905_s10  ;;  %1349 = vrot.lane.b32.xlu0 %v2598_v54, %s2904_s7 }
 0x1d5   : > { %v950_v35 = vpop.permute.xlu1 %949  ;;  %v1456_v18 = vpop.permute.xlu0 %1455 }
 0x1d6   : > { %v1769_v14 = vsel %vm1754_vm8, %v1736_v9, %v1456_v18  ;;  %v1640_v42 = vsel %vm1622_vm4, %v1607_v13, %v950_v35  ;;  %v1575_v9 = vsel %vm1556_vm2, %v1542_v27, %v4562_v49  ;;  %v2601_v35 = vld [vmem:[%s2988_s5 + $0x181] sm:$0xff]  ;;  %v4077_v13 = vld [vmem:[%s4463_s2] ss:$0 sm:$0xff] }
 0x1d7   : > { %1095 = vrot.lane.b32.xlu1 %v2629_v12, %s2902_s14  ;;  %969 = vrot.lane.b32.xlu0 %v2598_v54, %s2901_s9  ;;  %v2570_v18 = vld [vmem:[%s2988_s5 + $0x188] sm:$0xff]  ;;  %v2635_v49 = vld [vmem:[%s2988_s5 + $0x19a] sm:$0xff] }
 0x1d8   : > { %2744 = vmatprep.mubr.msk.f32.mxu0 %vm1799_vm9, %v1769_v14  ;;  %v1608_v14 = vsel %vm1589_vm3, %v1575_v9, %v4563_v53  ;;  %v2636_v27 = vld [vmem:[%s2988_s5 + $0x1a2] sm:$0xff] }
 0x1d9   : > { %v1458_v23 = vpop.permute.xlu1 %1457  ;;  %v1076_v48 = vpop.permute.xlu0 %1075 }
 0x1da   : > { %v1770_v52 = vsel %vm1754_vm8, %v1737_v60, %v1458_v23  ;;  %v1672_v4 = vsel %vm1655_vm5, %v1639_v22, %v1076_v48 }
 0x1db   : > { %1097 = vrot.lane.b32.xlu1 %v2536_v58, %s2902_s14  ;;  %1477 = vrot.lane.b32.xlu0 %v2536_v58, %s2905_s10 }
 0x1dc   : > { %2745 = vmatmul.mubr.msk.f32.gmra.mxu0 %vm1799_vm9, %v1770_v52 }
 0x1dd   : > { %v1204_v8 = vpop.permute.xlu1 %1203  ;;  %v1078_v61 = vpop.permute.xlu0 %1077 }
 0x1de   : > { %v1705_v31 = vsel %vm1688_vm6, %v1672_v4, %v1204_v8  ;;  %v1673_v12 = vsel %vm1655_vm5, %v1640_v42, %v1078_v61  ;;  %v2832_v61 = vld [vmem:[%s2988_s5 + $0xe0] sm:$0xff]  ;;  %v2540_v4 = vld [vmem:[%s2988_s5 + $0x18a] sm:$0xff] }
 0x1df   : > { %843 = vrot.lane.b32.xlu1 %v2473_v59, %s2900_s8  ;;  %1223 = vrot.lane.b32.xlu0 %v2473_v59, %s2903_s29  ;;  %v4568_v42 = vld [vmem:[#allocation46_spill] sm:$0xff] }
 0x1e1   : > { %v1332_v5 = vpop.permute.xlu1 %1331  ;;  %v1206_v36 = vpop.permute.xlu0 %1205 }
 0x1e2   : > { %v1738_v51 = vsel %vm1721_vm7, %v1705_v31, %v1332_v5  ;;  %v1706_v54 = vsel %vm1688_vm6, %v1673_v12, %v1206_v36  ;;  %v4565_v5 = vld [vmem:[#allocation43_spill] sm:$0xff]  ;;  %v2572_v31 = vld [vmem:[%s2988_s5 + $0x1a0] sm:$0xff] }
 0x1e3   : > { %1351 = vrot.lane.b32.xlu1 %v2599_v63, %s2904_s7  ;;  %1225 = vrot.lane.b32.xlu0 %v2568_v45, %s2903_s29 }
 0x1e5   : > { %v1334_v17 = vpop.permute.xlu1 %1333  ;;  %v952_v33 = vpop.permute.xlu0 %951 }
 0x1e6   : > { %v1739_v62 = vsel %vm1721_vm7, %v1706_v54, %v1334_v17  ;;  %v1641_v58 = vsel %vm1622_vm4, %v1608_v14, %v952_v33  ;;  %v2604_v54 = vld [vmem:[%s2988_s5 + $0x1a1] sm:$0xff] }
 0x1e7   : > { %971 = vrot.lane.b32.xlu1 %v2599_v63, %s2901_s9  ;;  %845 = vrot.lane.b32.xlu0 %v2568_v45, %s2900_s8  ;;  %v4564_v63 = vld [vmem:[#allocation17_spill] sm:$0xff] }
 0x1e8   : > { %v1543_v45 = vsel %vm1523_vm1, %v2832_v61, %v4564_v63  ;;  %v4571_v61 = vld [vmem:[#allocation45_spill] sm:$0xff] }
 0x1e9   : > { %v954_v57 = vpop.permute.xlu1 %953  ;;  %v1460_v11 = vpop.permute.xlu0 %1459  ;;  %v1576_v36 = vsel %vm1556_vm2, %v1543_v45, %v4565_v5 }
 0x1ea   : > { %v1771_v7 = vsel %vm1754_vm8, %v1738_v51, %v1460_v11  ;;  %v1609_v3 = vsel %vm1589_vm3, %v1576_v36, %v4566_v24  ;;  %v2833_v51 = vld [vmem:[%s2988_s5 + $0xf0] sm:$0xff] }
 0x1eb   : > { %1479 = vrot.lane.b32.xlu1 %v2631_v37, %s2905_s10  ;;  %1353 = vrot.lane.b32.xlu0 %v2600_v41, %s2904_s7  ;;  %v1642_v40 = vsel %vm1622_vm4, %v1609_v3, %v954_v57  ;;  %v4567_v57 = vld [vmem:[#allocation22_spill] sm:$0xff] }
 0x1ec   : > { %2747 = vmatprep.mubr.msk.f32.mxu1 %vm1799_vm9, %v1771_v7  ;;  %v1544_v11 = vsel %vm1523_vm1, %v2833_v51, %v4567_v57 }
 0x1ed   : > { %v1462_v56 = vpop.permute.xlu1 %1461  ;;  %v1080_v16 = vpop.permute.xlu0 %1079  ;;  %v1577_v7 = vsel %vm1556_vm2, %v1544_v11, %v4568_v42 }
 0x1ee   : > { %v1772_v20 = vsel %vm1754_vm8, %v1739_v62, %v1462_v56  ;;  %v1674_v60 = vsel %vm1655_vm5, %v1641_v58, %v1080_v16  ;;  %v2603_v62 = vld [vmem:[%s2988_s5 + $0x199] sm:$0xff] }
 0x1ef   : > { %1099 = vrot.lane.b32.xlu1 %v2631_v37, %s2902_s14  ;;  %973 = vrot.lane.b32.xlu0 %v2600_v41, %s2901_s9  ;;  %v2571_v37 = vld [vmem:[%s2988_s5 + $0x198] sm:$0xff] }
 0x1f0   : > { %2748 = vmatmul.mubr.msk.f32.vlgmr.msra.gmra.mxu1 %vm1799_vm9, %v1772_v20  ;;  %v4569_v56 = vld [vmem:[#allocation64_spill] sm:$0xff] }
 0x1f1   : > { %v1208_v26 = vpop.permute.xlu1 %1207  ;;  %v1082_v30 = vpop.permute.xlu0 %1081  ;;  %v1610_v16 = vsel %vm1589_vm3, %v1577_v7, %v4569_v56 }
 0x1f2   : > { %v1707_v23 = vsel %vm1688_vm6, %v1674_v60, %v1208_v26  ;;  %v1675_v17 = vsel %vm1655_vm5, %v1642_v40, %v1082_v30 }
 0x1f3   : > { %1101 = vrot.lane.b32.xlu1 %v2538_v28, %s2902_s14  ;;  %1481 = vrot.lane.b32.xlu0 %v2538_v28, %s2905_s10 }
 0x1f5   : > { %v1336_v38 = vpop.permute.xlu1 %1335  ;;  %v1210_v46 = vpop.permute.xlu0 %1209 }
 0x1f6   : > { %v1740_v48 = vsel %vm1721_vm7, %v1707_v23, %v1336_v38  ;;  %v1708_v33 = vsel %vm1688_vm6, %v1675_v17, %v1210_v46  ;;  %v2834_v23 = vld [vmem:[%s2988_s5 + $0xf8] sm:$0xff] }
 0x1f7   : > { %847 = vrot.lane.b32.xlu1 %v2475_v43, %s2900_s8  ;;  %1227 = vrot.lane.b32.xlu0 %v2475_v43, %s2903_s29 }
 0x1f9   : > { %v956_v21 = vpop.permute.xlu1 %955  ;;  %v4031_v6 = vpop.permute.xlu0 %829 }
 0x1fa   : > { %v1643_v30 = vsel %vm1622_vm4, %v1610_v16, %v956_v21 }
 0x1fb   : > { %1355 = vrot.lane.b32.xlu1 %v2601_v35, %s2904_s7  ;;  %1229 = vrot.lane.b32.xlu0 %v2570_v18, %s2903_s29 }
 0x1fd   : > { %v1464_v52 = vpop.permute.xlu1 %1463  ;;  %v1338_v59 = vpop.permute.xlu0 %1337 }
 0x1fe   : > { %v1773_v8 = vsel %vm1754_vm8, %v1740_v48, %v1464_v52  ;;  %v1741_v22 = vsel %vm1721_vm7, %v1708_v33, %v1338_v59  ;;  %v4570_v48 = vld [vmem:[#allocation21_spill] sm:$0xff] }
 0x1ff   : > { %975 = vrot.lane.b32.xlu1 %v2601_v35, %s2901_s9  ;;  %849 = vrot.lane.b32.xlu0 %v2570_v18, %s2900_s8  ;;  %s2675_s8 = sshll.u32 %s2982_s27, 8  ;;  %v1545_v52 = vsel %vm1523_vm1, %v2834_v23, %v4570_v48 }
 0x200   : > { %2750 = vmatprep.mubr.msk.f32.mxu1 %vm1799_vm9, %v1773_v8  ;;  %s4089_s27 = scalar_lea.vmem %s4464_s3, %s2675_s8  ;;  %v1578_v63 = vsel %vm1556_vm2, %v1545_v52, %v4571_v61 }
 0x201   : > { %v1084_v29 = vpop.permute.xlu1 %1083  ;;  %v4052_v34 = vpop.permute.xlu0 %957  ;;  %v1611_v5 = vsel %vm1589_vm3, %v1578_v63, %v4031_v6 }
 0x202   : > { %v1676_v38 = vsel %vm1655_vm5, %v1643_v30, %v1084_v29 }
 0x203   : > { %1483 = vrot.lane.b32.xlu1 %v2633_v10, %s2905_s10  ;;  %1357 = vrot.lane.b32.xlu0 %v2602_v1, %s2904_s7 }
 0x205   : > { %v4060_v32 = vpop.permute.xlu1 %1085  ;;  %v1466_v0 = vpop.permute.xlu0 %1465 }
 0x206   : > { %v1774_v39 = vsel %vm1754_vm8, %v1741_v22, %v1466_v0 }
 0x207   : > { %1103 = vrot.lane.b32.xlu1 %v2633_v10, %s2902_s14  ;;  %977 = vrot.lane.b32.xlu0 %v2602_v1, %s2901_s9  ;;  %v1644_v1 = vsel %vm1622_vm4, %v1611_v5, %v4052_v34 }
 0x208   : > { %2751 = vmatmul.mubr.msk.f32.gmra.mxu1 %vm1799_vm9, %v1774_v39  ;;  %v1677_v24 = vsel %vm1655_vm5, %v1644_v1, %v4060_v32 }
 0x209   : > { %v4067_v47 = vpop.permute.xlu1 %831  ;;  %v1212_v2 = vpop.permute.xlu0 %1211 }
 0x20a   : > { %v1709_v19 = vsel %vm1688_vm6, %v1676_v38, %v1212_v2  ;;  %v2835_v2 = vld [vmem:[%s2988_s5 + $0x108] sm:$0xff] }
 0x20b   : > { %1105 = vrot.lane.b32.xlu1 %v2540_v4, %s2902_s14  ;;  %1485 = vrot.lane.b32.xlu0 %v2540_v4, %s2905_s10 }
 0x20d   : > { %v1340_v41 = vpop.permute.xlu1 %1339  ;;  %v1214_v15 = vpop.permute.xlu0 %1213 }
 0x20e   : > { %v1742_v9 = vsel %vm1721_vm7, %v1709_v19, %v1340_v41  ;;  %v1710_v3 = vsel %vm1688_vm6, %v1677_v24, %v1214_v15  ;;  %v4573_v15 = vld [vmem:[#allocation48_spill] sm:$0xff] }
 0x20f   : > { %1233 = vrot.lane.b32.xlu1 %v2572_v31, %s2903_s29  ;;  %1231 = vrot.lane.b32.xlu0 %v2571_v37, %s2903_s29  ;;  %v4572_v31 = vld [vmem:[#allocation24_spill] sm:$0xff] }
 0x210   : > { %v2725_v12 = vpop.f32.mrf.mxu0  ;;  %v1546_v37 = vsel %vm1523_vm1, %v2835_v2, %v4572_v31 }
 0x211   : > { %v1972_v20 = vadd.f32 %v2725_v12, %v4077_v13  ;;  %v960_v28 = vpop.permute.xlu1 %959  ;;  %v4096_v26 = vpop.permute.xlu0 %833  ;;  %v1579_v51 = vsel %vm1556_vm2, %v1546_v37, %v4573_v15 }
 0x212   : > { %v1966_v43 = vpop.f32.mrf.mxu0  ;;  %v1612_v57 = vsel %vm1589_vm3, %v1579_v51, %v4067_v47 }
 0x213   : > { %v2195_v46 = vmul.f32 %v1972_v20, %v1972_v20  ;;  %2300 = vst.msk [vmem:[%s4089_s27 + $0x8] sm:$0xff] %vm1556_vm2, %v1972_v20  ;;  %v1967_v55 = vadd.f32 %v4077_v13, %v1966_v43  ;;  %1361 = vrot.lane.b32.xlu1 %v2604_v54, %s2904_s7  ;;  %1359 = vrot.lane.b32.xlu0 %v2603_v62, %s2904_s7  ;;  %v2126_v35 = vsel %vm1556_vm2, %v1972_v20, 0.0 }
 0x214   : > { %v1645_v62 = vsel %vm1622_vm4, %v1612_v57, %v960_v28 }
 0x215   : > { %v2125_v18 = vsel %vm1556_vm2, %v1967_v55, 0.0  ;;  %v2194_v53 = vmul.f32 %v1967_v55, %v1967_v55  ;;  %2299 = vst.msk [vmem:[%s4089_s27] sm:$0xff] %vm1556_vm2, %v1967_v55  ;;  %v1468_v14 = vpop.permute.xlu1 %1467  ;;  %v1342_v21 = vpop.permute.xlu0 %1341  ;;  %v2227_v59 = vsel %vm1556_vm2, %v2195_v46, 0.0 }
 0x216   : > { %v2127_v58 = vadd.f32 %v2126_v35, %v2125_v18  ;;  %v1775_v60 = vsel %vm1754_vm8, %v1742_v9, %v1468_v14  ;;  %v1743_v29 = vsel %vm1721_vm7, %v1710_v3, %v1342_v21  ;;  %v4574_v9 = vld [vmem:[#allocation23_spill] sm:$0xff] }
 0x217   : > { %v2226_v8 = vsel %vm1556_vm2, %v2194_v53, 0.0  ;;  %1489 = vrot.lane.b32.xlu1 %v2636_v27, %s2905_s10  ;;  %1487 = vrot.lane.b32.xlu0 %v2635_v49, %s2905_s10  ;;  %v1547_v35 = vsel %vm1523_vm1, %v3773_v44, %v4574_v9  ;;  %v4575_v18 = vld [vmem:[#allocation47_spill] sm:$0xff]  ;;  %s2840_s10 = sshll.u32 %s2906_s19, 4  ;;  %s2841_s10 = int_to_ptr.vmem [resolvable:$false] %s2840_s10 }
 0x218   : > { %v2228_v45 = vadd.f32 %v2227_v59, %v2226_v8  ;;  %2753 = vmatprep.mubr.msk.f32.mxu1 %vm1799_vm9, %v1775_v60  ;;  %v1580_v53 = vsel %vm1556_vm2, %v1547_v35, %v4575_v18  ;;  %s2842_s8 = scalar_lea.vmem %s2841_s10, 64 }
 0x219   : > { %v1088_v36 = vpop.permute.xlu1 %1087  ;;  %v962_v10 = vpop.permute.xlu0 %961  ;;  %v1613_v14 = vsel %vm1589_vm3, %v1580_v53, %v4096_v26 }
 0x21a   : > { %v1678_v16 = vsel %vm1655_vm5, %v1645_v62, %v1088_v36  ;;  %v1646_v60 = vsel %vm1622_vm4, %v1613_v14, %v962_v10 }
 0x21d   : > { %v1090_v40 = vpop.permute.xlu1 %1089  ;;  %v1470_v17 = vpop.permute.xlu0 %1469 }
 0x21e   : > { %v1776_v33 = vsel %vm1754_vm8, %v1743_v29, %v1470_v17  ;;  %v1679_v23 = vsel %vm1655_vm5, %v1646_v60, %v1090_v40  ;;  %v4576_v17 = vld [vmem:[#allocation26_spill] sm:$0xff] }
 0x21f   : > { %2754 = vmatmul.mubr.msk.f32.gmra.mxu1 %vm1799_vm9, %v1776_v33  ;;  %v1548_v33 = vsel %vm1523_vm1, %v3817_v25, %v4576_v17  ;;  %v236_v17 = vld [vmem:[%s2988_s5 + $0x140] sm:$0xff] }
 0x221   : > { %v4134_v6 = vpop.permute.xlu1 %835  ;;  %v1216_v22 = vpop.permute.xlu0 %1215 }
 0x222   : > { %v1711_v47 = vsel %vm1688_vm6, %v1678_v16, %v1216_v22  ;;  %v4579_v16 = vld [vmem:[#allocation49_spill] sm:$0xff] }
 0x224   : > { %v2728_v0 = vpop.f32.mrf.mxu0 }
 0x225   : > { %v1982_v34 = vadd.f32 %v2728_v0, %v4077_v13  ;;  %v1344_v39 = vpop.permute.xlu1 %1343  ;;  %v1218_v32 = vpop.permute.xlu0 %1217 }
 0x226   : > { %v1976_v4 = vpop.f32.mrf.mxu0  ;;  %v1744_v55 = vsel %vm1721_vm7, %v1711_v47, %v1344_v39  ;;  %v1712_v48 = vsel %vm1688_vm6, %v1679_v23, %v1218_v32 }
 0x227   : > { %2302 = vst.msk [vmem:[%s4089_s27 + $0x18] sm:$0xff] %vm1556_vm2, %v1982_v34  ;;  %v1977_v41 = vadd.f32 %v4077_v13, %v1976_v4  ;;  %v2197_v11 = vmul.f32 %v1982_v34, %v1982_v34  ;;  %v2130_v20 = vsel %vm1556_vm2, %v1982_v34, 0.0  ;;  %v4577_v34 = vld [vmem:[#allocation50_spill] sm:$0xff] }
 0x228   : > { %v1581_v39 = vsel %vm1556_vm2, %v1548_v33, %v4577_v34 }
 0x229   : > { %v2128_v42 = vsel %vm1556_vm2, %v1977_v41, 0.0  ;;  %v2196_v7 = vmul.f32 %v1977_v41, %v1977_v41  ;;  %2301 = vst.msk [vmem:[%s4089_s27 + $0x10] sm:$0xff] %vm1556_vm2, %v1977_v41  ;;  %v964_v12 = vpop.permute.xlu1 %963  ;;  %v4150_v54 = vpop.permute.xlu0 %837  ;;  %v2231_v46 = vsel %vm1556_vm2, %v2197_v11, 0.0  ;;  %v1614_v2 = vsel %vm1589_vm3, %v1581_v39, %v4134_v6 }
 0x22a   : > { %v2129_v56 = vadd.f32 %v2128_v42, %v2127_v58  ;;  %v1647_v15 = vsel %vm1622_vm4, %v1614_v2, %v964_v12 }
 0x22b   : > { %v2229_v30 = vsel %vm1556_vm2, %v2196_v7, 0.0 }
 0x22c   : > { %v2230_v43 = vadd.f32 %v2229_v30, %v2228_v45  ;;  %v2131_v38 = vadd.f32 %v2130_v20, %v2129_v56  ;;  %v4578_v56 = vld [vmem:[#allocation25_spill] sm:$0xff] }
 0x22d   : > { %v1472_v19 = vpop.permute.xlu1 %1471  ;;  %v1346_v27 = vpop.permute.xlu0 %1345  ;;  %v1549_v6 = vsel %vm1523_vm1, %v3836_v50, %v4578_v56 }
 0x22e   : > { %v1777_v49 = vsel %vm1754_vm8, %v1744_v55, %v1472_v19  ;;  %v2232_v28 = vadd.f32 %v2231_v46, %v2230_v43  ;;  %v1745_v44 = vsel %vm1721_vm7, %v1712_v48, %v1346_v27  ;;  %v1582_v12 = vsel %vm1556_vm2, %v1549_v6, %v4579_v16  ;;  %v235_v48 = vld [vmem:[%s2988_s5 + $0x138] sm:$0xff] }
 0x22f   : > { %2756 = vmatprep.mubr.msk.f32.mxu1 %vm1799_vm9, %v1777_v49  ;;  %v1615_v20 = vsel %vm1589_vm3, %v1582_v12, %v4150_v54 }
 0x231   : > { %v1092_v21 = vpop.permute.xlu1 %1091  ;;  %v966_v58 = vpop.permute.xlu0 %965 }
 0x232   : > { %v1680_v25 = vsel %vm1655_vm5, %v1647_v15, %v1092_v21  ;;  %v1648_v43 = vsel %vm1622_vm4, %v1615_v20, %v966_v58 }
 0x235   : > { %v1094_v52 = vpop.permute.xlu1 %1093  ;;  %v1474_v59 = vpop.permute.xlu0 %1473 }
 0x236   : > { %v1778_v8 = vsel %vm1754_vm8, %v1745_v44, %v1474_v59 }
 0x237   : > { %2757 = vmatmul.mubr.msk.f32.gmra.mxu1 %vm1799_vm9, %v1778_v8 }
 0x238   : > { %v2731_v61 = vpop.f32.mrf.mxu0 }
 0x239   : > { %v1992_v26 = vadd.f32 %v2731_v61, %v4077_v13  ;;  %v4175_v63 = vpop.permute.xlu1 %839  ;;  %v1220_v45 = vpop.permute.xlu0 %1219 }
 0x23a   : > { %v1986_v5 = vpop.f32.mrf.mxu0  ;;  %v1713_v57 = vsel %vm1688_vm6, %v1680_v25, %v1220_v45  ;;  %v4580_v45 = vld [vmem:[#allocation28_spill] sm:$0xff] }
 0x23b   : > { %2304 = vst.msk [vmem:[%s4089_s27 + $0x28] sm:$0xff] %vm1556_vm2, %v1992_v26  ;;  %v1987_v36 = vadd.f32 %v4077_v13, %v1986_v5  ;;  %v2199_v10 = vmul.f32 %v1992_v26, %v1992_v26  ;;  %v2134_v22 = vsel %vm1556_vm2, %v1992_v26, 0.0  ;;  %v1550_v5 = vsel %vm1523_vm1, %v235_v48, %v4580_v45 }
 0x23d   : > { %v2132_v1 = vsel %vm1556_vm2, %v1987_v36, 0.0  ;;  %v2198_v24 = vmul.f32 %v1987_v36, %v1987_v36  ;;  %2303 = vst.msk [vmem:[%s4089_s27 + $0x20] sm:$0xff] %vm1556_vm2, %v1987_v36  ;;  %v1348_v3 = vpop.permute.xlu1 %1347  ;;  %v1222_v29 = vpop.permute.xlu0 %1221  ;;  %v2235_v31 = vsel %vm1556_vm2, %v2199_v10, 0.0  ;;  %v4581_v36 = vld [vmem:[#allocation52_spill] sm:$0xff] }
 0x23e   : > { %v2133_v40 = vadd.f32 %v2132_v1, %v2131_v38  ;;  %v1746_v11 = vsel %vm1721_vm7, %v1713_v57, %v1348_v3  ;;  %v1681_v38 = vsel %vm1655_vm5, %v1648_v43, %v1094_v52  ;;  %v1583_v10 = vsel %vm1556_vm2, %v1550_v5, %v4581_v36 }
 0x23f   : > { %v2233_v0 = vsel %vm1556_vm2, %v2198_v24, 0.0  ;;  %v1714_v46 = vsel %vm1688_vm6, %v1681_v38, %v1222_v29  ;;  %v1616_v1 = vsel %vm1589_vm3, %v1583_v10, %v4175_v63  ;;  %v4586_v10 = vld [vmem:[#allocation30_spill] sm:$0xff] }
 0x240   : > { %v2234_v32 = vadd.f32 %v2233_v0, %v2232_v28  ;;  %v2135_v4 = vadd.f32 %v2134_v22, %v2133_v40 }
 0x241   : > { %v968_v37 = vpop.permute.xlu1 %967  ;;  %v842_v41 = vpop.permute.xlu0 %841 }
 0x242   : > { %v2236_v51 = vadd.f32 %v2235_v31, %v2234_v32  ;;  %v1649_v29 = vsel %vm1622_vm4, %v1616_v1, %v968_v37  ;;  %v4582_v32 = vld [vmem:[#allocation27_spill] sm:$0xff] }
 0x243   : > { %v1551_v63 = vsel %vm1523_vm1, %v236_v17, %v4582_v32 }
 0x245   : > { %v1476_v42 = vpop.permute.xlu1 %1475  ;;  %v1350_v7 = vpop.permute.xlu0 %1349 }
 0x246   : > { %v1779_v62 = vsel %vm1754_vm8, %v1746_v11, %v1476_v42  ;;  %v1747_v50 = vsel %vm1721_vm7, %v1714_v46, %v1350_v7 }
 0x247   : > { %2759 = vmatprep.mubr.msk.f32.mxu1 %vm1799_vm9, %v1779_v62 }
 0x249   : > { %v1096_v30 = vpop.permute.xlu1 %1095  ;;  %v970_v47 = vpop.permute.xlu0 %969 }
 0x24a   : > { %v1682_v40 = vsel %vm1655_vm5, %v1649_v29, %v1096_v30  ;;  %v4587_v29 = vld [vmem:[#allocation53_spill] sm:$0xff] }
 0x24c   : > { %v2734_v55 = vpop.f32.mrf.mxu0 }
 0x24d   : > { %v2002_v19 = vadd.f32 %v2734_v55, %v4077_v13  ;;  %v1098_v27 = vpop.permute.xlu1 %1097  ;;  %v1478_v49 = vpop.permute.xlu0 %1477 }
 0x24e   : > { %v1780_v28 = vsel %vm1754_vm8, %v1747_v50, %v1478_v49  ;;  %v1996_v54 = vpop.f32.mrf.mxu0 }
 0x24f   : > { %2306 = vst.msk [vmem:[%s4089_s27 + $0x38] sm:$0xff] %vm1556_vm2, %v2002_v19  ;;  %v1997_v9 = vadd.f32 %v4077_v13, %v1996_v54  ;;  %2760 = vmatmul.mubr.msk.f32.gmra.mxu1 %vm1799_vm9, %v1780_v28  ;;  %v2201_v35 = vmul.f32 %v2002_v19, %v2002_v19  ;;  %v2138_v60 = vsel %vm1556_vm2, %v2002_v19, 0.0  ;;  %v237_v28 = vld [vmem:[%s2988_s5 + $0x150] sm:$0xff] }
 0x251   : > { %v2136_v18 = vsel %vm1556_vm2, %v1997_v9, 0.0  ;;  %v2200_v53 = vmul.f32 %v1997_v9, %v1997_v9  ;;  %2305 = vst.msk [vmem:[%s4089_s27 + $0x30] sm:$0xff] %vm1556_vm2, %v1997_v9  ;;  %v4219_v14 = vpop.permute.xlu1 %843  ;;  %v1224_v21 = vpop.permute.xlu0 %1223  ;;  %v2239_v59 = vsel %vm1556_vm2, %v2201_v35, 0.0  ;;  %v4584_v35 = vld [vmem:[#allocation31_spill] sm:$0xff] }
 0x252   : > { %v2137_v58 = vadd.f32 %v2136_v18, %v2135_v4  ;;  %v1715_v33 = vsel %vm1688_vm6, %v1682_v40, %v1224_v21  ;;  %v4583_v4 = vld [vmem:[#allocation51_spill] sm:$0xff]  ;;  %v1552_v18 = vsel %vm1523_vm1, %v237_v28, %v4584_v35 }
 0x253   : > { %v2237_v23 = vsel %vm1556_vm2, %v2200_v53, 0.0  ;;  %v1584_v2 = vsel %vm1556_vm2, %v1551_v63, %v4583_v4  ;;  %v4585_v53 = vld [vmem:[#allocation54_spill] sm:$0xff] }
 0x254   : > { %v2238_v44 = vadd.f32 %v2237_v23, %v2236_v51  ;;  %v2139_v52 = vadd.f32 %v2138_v60, %v2137_v58  ;;  %v1617_v37 = vsel %vm1589_vm3, %v1584_v2, %v842_v41  ;;  %v1585_v21 = vsel %vm1556_vm2, %v1552_v18, %v4585_v53 }
 0x255   : > { %v1352_v8 = vpop.permute.xlu1 %1351  ;;  %v1226_v61 = vpop.permute.xlu0 %1225  ;;  %v1650_v57 = vsel %vm1622_vm4, %v1617_v37, %v970_v47  ;;  %v1618_v58 = vsel %vm1589_vm3, %v1585_v21, %v4219_v14 }
 0x256   : > { %v2240_v26 = vadd.f32 %v2239_v59, %v2238_v44  ;;  %v1748_v22 = vsel %vm1721_vm7, %v1715_v33, %v1352_v8  ;;  %v1683_v42 = vsel %vm1655_vm5, %v1650_v57, %v1098_v27 }
 0x257   : > { %v1716_v62 = vsel %vm1688_vm6, %v1683_v42, %v1226_v61 }
 0x259   : > { %v972_v24 = vpop.permute.xlu1 %971  ;;  %v4231_v3 = vpop.permute.xlu0 %845 }
 0x25a   : > { %v1651_v48 = vsel %vm1622_vm4, %v1618_v58, %v972_v24 }
 0x25d   : > { %v1480_v0 = vpop.permute.xlu1 %1479  ;;  %v1354_v34 = vpop.permute.xlu0 %1353 }
 0x25e   : > { %v1781_v39 = vsel %vm1754_vm8, %v1748_v22, %v1480_v0  ;;  %v1749_v56 = vsel %vm1721_vm7, %v1716_v62, %v1354_v34  ;;  %v240_v62 = vld [vmem:[%s2988_s5 + $0x170] sm:$0xff] }
 0x25f   : > { %2762 = vmatprep.mubr.msk.f32.mxu1 %vm1799_vm9, %v1781_v39 }
 0x260   : > { %v2737_v31 = vpop.f32.mrf.mxu0 }
 0x261   : > { %v2012_v15 = vadd.f32 %v2737_v31, %v4077_v13  ;;  %v1100_v51 = vpop.permute.xlu1 %1099  ;;  %v974_v25 = vpop.permute.xlu0 %973 }
 0x262   : > { %v2006_v11 = vpop.f32.mrf.mxu0  ;;  %v1684_v44 = vsel %vm1655_vm5, %v1651_v48, %v1100_v51 }
 0x263   : > { %2308 = vst.msk [vmem:[%s4089_s27 + $0x48] sm:$0xff] %vm1556_vm2, %v2012_v15  ;;  %v2007_v7 = vadd.f32 %v4077_v13, %v2006_v11  ;;  %v2203_v6 = vmul.f32 %v2012_v15, %v2012_v15  ;;  %v2142_v43 = vsel %vm1556_vm2, %v2012_v15, 0.0 }
 0x265   : > { %v2140_v41 = vsel %vm1556_vm2, %v2007_v7, 0.0  ;;  %v2202_v16 = vmul.f32 %v2007_v7, %v2007_v7  ;;  %2307 = vst.msk [vmem:[%s4089_s27 + $0x40] sm:$0xff] %vm1556_vm2, %v2007_v7  ;;  %v1102_v12 = vpop.permute.xlu1 %1101  ;;  %v1482_v20 = vpop.permute.xlu0 %1481  ;;  %v2243_v50 = vsel %vm1556_vm2, %v2203_v6, 0.0 }
 0x266   : > { %v2141_v30 = vadd.f32 %v2140_v41, %v2139_v52  ;;  %v1782_v47 = vsel %vm1754_vm8, %v1749_v56, %v1482_v20  ;;  %v238_v52 = vld [vmem:[%s2988_s5 + $0x158] sm:$0xff]  ;;  %v239_v56 = vld [vmem:[%s2988_s5 + $0x168] sm:$0xff]  ;;  %s196_s5 = sand.u32 1, %s2888_s16  }
 0x267   : > { %v2241_v38 = vsel %vm1556_vm2, %v2202_v16, 0.0  ;;  %2763 = vmatmul.mubr.msk.f32.gmra.mxu1 %vm1799_vm9, %v1782_v47  ;;  %v1553_v1 = vsel %vm1523_vm1, %v238_v52, %v4586_v10  ;;  %v4588_v16 = vld [vmem:[#allocation32_spill] sm:$0xff]  ;;  %v4589_v20 = vld [vmem:[#allocation33_spill] sm:$0xff]  ;;  %v4590_v47 = vld [vmem:[#allocation55_spill] sm:$0xff]  ;;  %s2441_s14 = sshll.u32 %s196_s5, 1  ;;  %s2337_s6 = scalar_lea.sflag [#allocation3], %s196_s5 }
 0x268   : > { %v2242_v46 = vadd.f32 %v2241_v38, %v2240_v26  ;;  %v2143_v55 = vadd.f32 %v2142_v43, %v2141_v30  ;;  %v1586_v40 = vsel %vm1556_vm2, %v1553_v1, %v4587_v29  ;;  %v1554_v30 = vsel %vm1523_vm1, %v239_v56, %v4589_v20  ;;  %v4591_v38 = vld [vmem:[#allocation56_spill] sm:$0xff]  ;;  %s198_s22 = scalar_lea.vmem [#allocation2], %s2441_s14 }
 0x269   : > { %v848_v19 = vpop.permute.xlu1 %847  ;;  %v1228_v27 = vpop.permute.xlu0 %1227  ;;  %v1619_v17 = vsel %vm1589_vm3, %v1586_v40, %v4231_v3  ;;  %s2353_s23 = sshll.u32 %s198_s22, 4  ;;  %s2354_s23 = int_to_ptr.vmem [resolvable:$true] %s2353_s23 }
 0x26a   : > { %v2244_v49 = vadd.f32 %v2243_v50, %v2242_v46  ;;  %v1717_v59 = vsel %vm1688_vm6, %v1684_v44, %v1228_v27  ;;  %v1652_v32 = vsel %vm1622_vm4, %v1619_v17, %v974_v25  ;;  %v1587_v46 = vsel %vm1556_vm2, %v1554_v30, %v4591_v38  ;;  %s2836_s7 = scalar_lea.vmem %s2354_s23, 32  ;;  %p2843_p0 = scmp.lt.s32.totalorder %s2354_s23, %s2841_s10 }
 0x26b   : > { %v1685_v4 = vsel %vm1655_vm5, %v1652_v32, %v1102_v12  ;;  %v1555_v12 = vsel %vm1523_vm1, %v240_v62, %v4588_v16  ;;  %p2837_p11 = scmp.ne.s32.totalorder %s2354_s23, %s2836_s7  ;;  %p2844_p1 = scmp.lt.s32.totalorder %s2842_s8, %s2836_s7 }
 0x26c   : > { %v1588_v43 = vsel %vm1556_vm2, %v1555_v12, %v4590_v47 }
 0x26d   : > { %v1356_v54 = vpop.permute.xlu1 %1355  ;;  %v1230_v9 = vpop.permute.xlu0 %1229  ;;  %p2838_p12 = pnand %p2837_p11, %p2970_p5  ;;  %p2845_p2 = por %p2844_p1, %p2843_p0 }
 0x26e   : > { %v1750_v61 = vsel %vm1721_vm7, %v1717_v59, %v1356_v54  ;;  %v1718_v3 = vsel %vm1688_vm6, %v1685_v4, %v1230_v9 }
 0x26f   : > { %p2839_p13 = pneg %p2838_p12 }
 0x271   : > { %v976_v60 = vpop.permute.xlu1 %975  ;;  %v850_v23 = vpop.permute.xlu0 %849  ;;  %p2846_p3 = pnand %p2845_p2, %p2839_p13 }
 0x272   : > { %v1621_v50 = vsel %vm1589_vm3, %v1588_v43, %v850_v23 }
 0x274   : > { %v2740_v8 = vpop.f32.mrf.mxu0 }
 0x275   : > { %v2022_v26 = vadd.f32 %v2740_v8, %v4077_v13  ;;  %v1484_v45 = vpop.permute.xlu1 %1483  ;;  %v1358_v5 = vpop.permute.xlu0 %1357 }
 0x276   : > { %v1783_v36 = vsel %vm1754_vm8, %v1750_v61, %v1484_v45  ;;  %v2016_v14 = vpop.f32.mrf.mxu0  ;;  %v1751_v57 = vsel %vm1721_vm7, %v1718_v3, %v1358_v5 }
 0x277   : > { %2310 = vst.msk [vmem:[%s4089_s27 + $0x58] sm:$0xff] %vm1556_vm2, %v2022_v26  ;;  %v2017_v24 = vadd.f32 %v4077_v13, %v2016_v14  ;;  %2765 = vmatprep.mubr.msk.f32.mxu1 %vm1799_vm9, %v1783_v36  ;;  %v2205_v33 = vmul.f32 %v2022_v26, %v2022_v26  ;;  %v2146_v2 = vsel %vm1556_vm2, %v2022_v26, 0.0 }
 0x279   : > { %v2144_v22 = vsel %vm1556_vm2, %v2017_v24, 0.0  ;;  %v2204_v0 = vmul.f32 %v2017_v24, %v2017_v24  ;;  %2309 = vst.msk [vmem:[%s4089_s27 + $0x50] sm:$0xff] %vm1556_vm2, %v2017_v24  ;;  %v1104_v34 = vpop.permute.xlu1 %1103  ;;  %v978_v39 = vpop.permute.xlu0 %977  ;;  %v2247_v51 = vsel %vm1556_vm2, %v2205_v33, 0.0 }
 0x27a   : > { %v2145_v63 = vadd.f32 %v2144_v22, %v2143_v55  ;;  %v1620_v55 = vsel %vm1589_vm3, %v1587_v46, %v848_v19  ;;  %v1654_v54 = vsel %vm1622_vm4, %v1621_v50, %v978_v39 }
 0x27b   : > { %v2245_v31 = vsel %vm1556_vm2, %v2204_v0, 0.0  ;;  %v1653_v28 = vsel %vm1622_vm4, %v1620_v55, %v976_v60 }
 0x27c   : > { %v2246_v37 = vadd.f32 %v2245_v31, %v2244_v49  ;;  %v2147_v15 = vadd.f32 %v2146_v2, %v2145_v63  ;;  %v1686_v9 = vsel %vm1655_vm5, %v1653_v28, %v1104_v34 }
 0x27d   : > { %v1106_v11 = vpop.permute.xlu1 %1105  ;;  %v1486_v42 = vpop.permute.xlu0 %1485 }
 0x27e   : > { %v1784_v25 = vsel %vm1754_vm8, %v1751_v57, %v1486_v42  ;;  %v2248_v7 = vadd.f32 %v2247_v51, %v2246_v37  ;;  %v1687_v35 = vsel %vm1655_vm5, %v1654_v54, %v1106_v11 }
 0x27f   : > { %2766 = vmatmul.mubr.msk.f32.gmra.mxu1 %vm1799_vm9, %v1784_v25 }
 0x281   : > { %v1234_v6 = vpop.permute.xlu1 %1233  ;;  %v1232_v41 = vpop.permute.xlu0 %1231 }
 0x282   : > { %v1720_v18 = vsel %vm1688_vm6, %v1687_v35, %v1234_v6  ;;  %v1719_v53 = vsel %vm1688_vm6, %v1686_v9, %v1232_v41 }
 0x285   : > { %v1362_v27 = vpop.permute.xlu1 %1361  ;;  %v1360_v49 = vpop.permute.xlu0 %1359 }
 0x286   : > { %v1753_v19 = vsel %vm1721_vm7, %v1720_v18, %v1362_v27  ;;  %v1752_v58 = vsel %vm1721_vm7, %v1719_v53, %v1360_v49 }
 0x288   : > { %v2743_v21 = vpop.f32.mrf.mxu0 }
 0x289   : > { %v2032_v23 = vadd.f32 %v2743_v21, %v4077_v13  ;;  %v1490_v48 = vpop.permute.xlu1 %1489  ;;  %v1488_v60 = vpop.permute.xlu0 %1487 }
 0x28a   : > { %v1786_v44 = vsel %vm1754_vm8, %v1753_v19, %v1490_v48  ;;  %v1785_v52 = vsel %vm1754_vm8, %v1752_v58, %v1488_v60  ;;  %v2026_v59 = vpop.f32.mrf.mxu0 }
 0x28b   : > { %2312 = vst.msk [vmem:[%s4089_s27 + $0x68] sm:$0xff] %vm1556_vm2, %v2032_v23  ;;  %v2027_v8 = vadd.f32 %v4077_v13, %v2026_v59  ;;  %2768 = vmatprep.mubr.msk.f32.mxu1 %vm1799_vm9, %v1785_v52  ;;  %v2207_v61 = vmul.f32 %v2032_v23, %v2032_v23  ;;  %v2150_v36 = vsel %vm1556_vm2, %v2032_v23, 0.0 }
 0x28c   : > { %2769 = vmatmul.mubr.msk.f32.gmra.mxu1 %vm1799_vm9, %v1786_v44 }
 0x28d   : > { %v2148_v26 = vsel %vm1556_vm2, %v2027_v8, 0.0  ;;  %v2206_v45 = vmul.f32 %v2027_v8, %v2027_v8  ;;  %2311 = vst.msk [vmem:[%s4089_s27 + $0x60] sm:$0xff] %vm1556_vm2, %v2027_v8  ;;  %v2251_v24 = vsel %vm1556_vm2, %v2207_v61, 0.0 }
 0x28e   : > { %v2149_v5 = vadd.f32 %v2148_v26, %v2147_v15 }
 0x28f   : > { %v2249_v14 = vsel %vm1556_vm2, %v2206_v45, 0.0 }
 0x290   : > { %v2250_v10 = vadd.f32 %v2249_v14, %v2248_v7  ;;  %v2151_v1 = vadd.f32 %v2150_v36, %v2149_v5 }
 0x292   : > { %v2252_v29 = vadd.f32 %v2251_v24, %v2250_v10 }
 0x29c   : > { %v2746_v40 = vpop.f32.mrf.mxu0 }
 0x29d   : > { %v2042_v17 = vadd.f32 %v2746_v40, %v4077_v13 }
 0x29e   : > { %v2036_v33 = vpop.f32.mrf.mxu0 }
 0x29f   : > { %2314 = vst.msk [vmem:[%s4089_s27 + $0x78] sm:$0xff] %vm1556_vm2, %v2042_v17  ;;  %v2037_v22 = vadd.f32 %v4077_v13, %v2036_v33  ;;  %v2209_v0 = vmul.f32 %v2042_v17, %v2042_v17  ;;  %v2154_v63 = vsel %vm1556_vm2, %v2042_v17, 0.0 }
 0x2a1   : > { %v2152_v34 = vsel %vm1556_vm2, %v2037_v22, 0.0  ;;  %v2208_v39 = vmul.f32 %v2037_v22, %v2037_v22  ;;  %2313 = vst.msk [vmem:[%s4089_s27 + $0x70] sm:$0xff] %vm1556_vm2, %v2037_v22  ;;  %v2255_v3 = vsel %vm1556_vm2, %v2209_v0, 0.0 }
 0x2a2   : > { %v2153_v32 = vadd.f32 %v2152_v34, %v2151_v1 }
 0x2a3   : > { %v2253_v4 = vsel %vm1556_vm2, %v2208_v39, 0.0 }
 0x2a4   : > { %v2254_v2 = vadd.f32 %v2253_v4, %v2252_v29  ;;  %v2155_v31 = vadd.f32 %v2154_v63, %v2153_v32 }
 0x2a6   : > { %v2256_v37 = vadd.f32 %v2255_v3, %v2254_v2 }
 0x2b0   : > { %v2749_v15 = vpop.f32.mrf.mxu1 }
 0x2b1   : > { %v2052_v51 = vadd.f32 %v2749_v15, %v4077_v13 }
 0x2b2   : > { %v2046_v57 = vpop.f32.mrf.mxu1 }
 0x2b3   : > { %2316 = vst.msk [vmem:[%s4089_s27 + $0x88] sm:$0xff] %vm1556_vm2, %v2052_v51  ;;  %v2047_v11 = vadd.f32 %v4077_v13, %v2046_v57  ;;  %v2211_v42 = vmul.f32 %v2052_v51, %v2052_v51  ;;  %v2158_v56 = vsel %vm1556_vm2, %v2052_v51, 0.0 }
 0x2b5   : > { %v2156_v25 = vsel %vm1556_vm2, %v2047_v11, 0.0  ;;  %v2210_v7 = vmul.f32 %v2047_v11, %v2047_v11  ;;  %2315 = vst.msk [vmem:[%s4089_s27 + $0x80] sm:$0xff] %vm1556_vm2, %v2047_v11  ;;  %v2259_v12 = vsel %vm1556_vm2, %v2211_v42, 0.0 }
 0x2b6   : > { %v2157_v62 = vadd.f32 %v2156_v25, %v2155_v31 }
 0x2b7   : > { %v2257_v6 = vsel %vm1556_vm2, %v2210_v7, 0.0 }
 0x2b8   : > { %v2258_v41 = vadd.f32 %v2257_v6, %v2256_v37  ;;  %v2159_v16 = vadd.f32 %v2158_v56, %v2157_v62 }
 0x2ba   : > { %v2260_v20 = vadd.f32 %v2259_v12, %v2258_v41 }
 0x2c8   : > { %v2752_v30 = vpop.f32.mrf.mxu1 }
 0x2c9   : > { %v2062_v47 = vadd.f32 %v2752_v30, %v4077_v13 }
 0x2ca   : > { %v2056_v43 = vpop.f32.mrf.mxu1 }
 0x2cb   : > { %2318 = vst.msk [vmem:[%s4089_s27 + $0x98] sm:$0xff] %vm1556_vm2, %v2062_v47  ;;  %v2057_v38 = vadd.f32 %v4077_v13, %v2056_v43  ;;  %v2213_v46 = vmul.f32 %v2062_v47, %v2062_v47  ;;  %v2162_v49 = vsel %vm1556_vm2, %v2062_v47, 0.0 }
 0x2cd   : > { %v2160_v55 = vsel %vm1556_vm2, %v2057_v38, 0.0  ;;  %v2212_v50 = vmul.f32 %v2057_v38, %v2057_v38  ;;  %2317 = vst.msk [vmem:[%s4089_s27 + $0x90] sm:$0xff] %vm1556_vm2, %v2057_v38  ;;  %v2263_v35 = vsel %vm1556_vm2, %v2213_v46, 0.0 }
 0x2ce   : > { %v2161_v27 = vadd.f32 %v2160_v55, %v2159_v16 }
 0x2cf   : > { %v2261_v28 = vsel %vm1556_vm2, %v2212_v50, 0.0 }
 0x2d0   : > { %v2262_v54 = vadd.f32 %v2261_v28, %v2260_v20  ;;  %v2163_v9 = vadd.f32 %v2162_v49, %v2161_v27 }
 0x2d2   : > { %v2264_v18 = vadd.f32 %v2263_v35, %v2262_v54 }
 0x2df   : > { %v2755_v53 = vpop.f32.mrf.mxu1 }
 0x2e0   : > { %v2072_v21 = vadd.f32 %v2755_v53, %v4077_v13 }
 0x2e1   : > { %v2066_v19 = vpop.f32.mrf.mxu1 }
 0x2e2   : > { %2320 = vst.msk [vmem:[%s4089_s27 + $0xa8] sm:$0xff] %vm1556_vm2, %v2072_v21  ;;  %v2067_v58 = vadd.f32 %v4077_v13, %v2066_v19  ;;  %v2215_v23 = vmul.f32 %v2072_v21, %v2072_v21  ;;  %v2166_v52 = vsel %vm1556_vm2, %v2072_v21, 0.0 }
 0x2e4   : > { %v2164_v48 = vsel %vm1556_vm2, %v2067_v58, 0.0  ;;  %v2214_v60 = vmul.f32 %v2067_v58, %v2067_v58  ;;  %2319 = vst.msk [vmem:[%s4089_s27 + $0xa0] sm:$0xff] %vm1556_vm2, %v2067_v58  ;;  %v2267_v26 = vsel %vm1556_vm2, %v2215_v23, 0.0 }
 0x2e5   : > { %v2165_v44 = vadd.f32 %v2164_v48, %v2163_v9 }
 0x2e6   : > { %v2265_v59 = vsel %vm1556_vm2, %v2214_v60, 0.0 }
 0x2e7   : > { %v2266_v8 = vadd.f32 %v2265_v59, %v2264_v18  ;;  %v2167_v61 = vadd.f32 %v2166_v52, %v2165_v44 }
 0x2e9   : > { %v2268_v45 = vadd.f32 %v2267_v26, %v2266_v8 }
 0x2f7   : > { %v2758_v5 = vpop.f32.mrf.mxu1 }
 0x2f8   : > { %v2082_v36 = vadd.f32 %v2758_v5, %v4077_v13 }
 0x2f9   : > { %v2076_v14 = vpop.f32.mrf.mxu1 }
 0x2fa   : > { %2322 = vst.msk [vmem:[%s4089_s27 + $0xb8] sm:$0xff] %vm1556_vm2, %v2082_v36  ;;  %v2077_v10 = vadd.f32 %v4077_v13, %v2076_v14  ;;  %v2217_v1 = vmul.f32 %v2082_v36, %v2082_v36  ;;  %v2170_v17 = vsel %vm1556_vm2, %v2082_v36, 0.0 }
 0x2fc   : > { %v2168_v24 = vsel %vm1556_vm2, %v2077_v10, 0.0  ;;  %v2216_v29 = vmul.f32 %v2077_v10, %v2077_v10  ;;  %2321 = vst.msk [vmem:[%s4089_s27 + $0xb0] sm:$0xff] %vm1556_vm2, %v2077_v10  ;;  %v2271_v34 = vsel %vm1556_vm2, %v2217_v1, 0.0 }
 0x2fd   : > { %v2169_v40 = vadd.f32 %v2168_v24, %v2167_v61 }
 0x2fe   : > { %v2269_v33 = vsel %vm1556_vm2, %v2216_v29, 0.0 }
 0x2ff   : > { %v2270_v22 = vadd.f32 %v2269_v33, %v2268_v45  ;;  %v2171_v0 = vadd.f32 %v2170_v17, %v2169_v40 }
 0x301   : > { %v2272_v39 = vadd.f32 %v2271_v34, %v2270_v22 }
 0x30f   : > { %v2761_v32 = vpop.f32.mrf.mxu1 }
 0x310   : > { %v2092_v63 = vadd.f32 %v2761_v32, %v4077_v13 }
 0x311   : > { %v2086_v4 = vpop.f32.mrf.mxu1 }
 0x312   : > { %2324 = vst.msk [vmem:[%s4089_s27 + $0xc8] sm:$0xff] %vm1556_vm2, %v2092_v63  ;;  %v2087_v2 = vadd.f32 %v4077_v13, %v2086_v4  ;;  %v2219_v62 = vmul.f32 %v2092_v63, %v2092_v63  ;;  %v2174_v12 = vsel %vm1556_vm2, %v2092_v63, 0.0 }
 0x314   : > { %2323 = vst.msk [vmem:[%s4089_s27 + $0xc0] sm:$0xff] %vm1556_vm2, %v2087_v2  ;;  %v2218_v51 = vmul.f32 %v2087_v2, %v2087_v2  ;;  %v2172_v57 = vsel %vm1556_vm2, %v2087_v2, 0.0  ;;  %v2275_v47 = vsel %vm1556_vm2, %v2219_v62, 0.0 }
 0x315   : > { %v2173_v25 = vadd.f32 %v2172_v57, %v2171_v0 }
 0x316   : > { %v2273_v11 = vsel %vm1556_vm2, %v2218_v51, 0.0 }
 0x317   : > { %v2274_v41 = vadd.f32 %v2273_v11, %v2272_v39  ;;  %v2175_v30 = vadd.f32 %v2174_v12, %v2173_v25 }
 0x319   : > { %v2276_v46 = vadd.f32 %v2275_v47, %v2274_v41 }
 0x327   : > { %v2764_v31 = vpop.f32.mrf.mxu1 }
 0x328   : > { %v2102_v3 = vadd.f32 %v2764_v31, %v4077_v13 }
 0x329   : > { %v2096_v37 = vpop.f32.mrf.mxu1 }
 0x32a   : > { %2326 = vst.msk [vmem:[%s4089_s27 + $0xd8] sm:$0xff] %vm1556_vm2, %v2102_v3  ;;  %v2097_v15 = vadd.f32 %v4077_v13, %v2096_v37  ;;  %v2221_v55 = vmul.f32 %v2102_v3, %v2102_v3  ;;  %v2178_v49 = vsel %vm1556_vm2, %v2102_v3, 0.0 }
 0x32c   : > { %2325 = vst.msk [vmem:[%s4089_s27 + $0xd0] sm:$0xff] %vm1556_vm2, %v2097_v15  ;;  %v2220_v56 = vmul.f32 %v2097_v15, %v2097_v15  ;;  %v2176_v20 = vsel %vm1556_vm2, %v2097_v15, 0.0  ;;  %v2279_v9 = vsel %vm1556_vm2, %v2221_v55, 0.0 }
 0x32d   : > { %v2177_v38 = vadd.f32 %v2176_v20, %v2175_v30 }
 0x32e   : > { %v2277_v43 = vsel %vm1556_vm2, %v2220_v56, 0.0 }
 0x32f   : > { %v2278_v27 = vadd.f32 %v2277_v43, %v2276_v46  ;;  %v2179_v54 = vadd.f32 %v2178_v49, %v2177_v38 }
 0x331   : > { %v2280_v53 = vadd.f32 %v2279_v9, %v2278_v27 }
 0x33f   : > { %v2767_v42 = vpop.f32.mrf.mxu1 }
 0x340   : > { %v2112_v7 = vadd.f32 %v2767_v42, %v4077_v13 }
 0x341   : > { %v2106_v6 = vpop.f32.mrf.mxu1 }
 0x342   : > { %2328 = vst.msk [vmem:[%s4089_s27 + $0xe8] sm:$0xff] %vm1556_vm2, %v2112_v7  ;;  %v2107_v16 = vadd.f32 %v4077_v13, %v2106_v6  ;;  %v2223_v19 = vmul.f32 %v2112_v7, %v2112_v7  ;;  %v2182_v60 = vsel %vm1556_vm2, %v2112_v7, 0.0 }
 0x344   : > { %2327 = vst.msk [vmem:[%s4089_s27 + $0xe0] sm:$0xff] %vm1556_vm2, %v2107_v16  ;;  %v2222_v50 = vmul.f32 %v2107_v16, %v2107_v16  ;;  %v2180_v28 = vsel %vm1556_vm2, %v2107_v16, 0.0  ;;  %v2283_v59 = vsel %vm1556_vm2, %v2223_v19, 0.0 }
 0x345   : > { %v2181_v18 = vadd.f32 %v2180_v28, %v2179_v54 }
 0x346   : > { %v2281_v35 = vsel %vm1556_vm2, %v2222_v50, 0.0 }
 0x347   : > { %v2282_v23 = vadd.f32 %v2281_v35, %v2280_v53  ;;  %v2183_v52 = vadd.f32 %v2182_v60, %v2181_v18 }
 0x349   : > { %v2284_v5 = vadd.f32 %v2283_v59, %v2282_v23 }
 0x34c   : > { %v2770_v21 = vpop.f32.mrf.mxu1 }
 0x34d   : > { %v2122_v58 = vadd.f32 %v2770_v21, %v4077_v13 }
 0x34e   : > { %v2116_v48 = vpop.f32.mrf.mxu1 }
 0x34f   : > { %2330 = vst.msk [vmem:[%s4089_s27 + $0xf8] sm:$0xff] %vm1556_vm2, %v2122_v58  ;;  %v2117_v44 = vadd.f32 %v4077_v13, %v2116_v48  ;;  %v2225_v8 = vmul.f32 %v2122_v58, %v2122_v58  ;;  %v2186_v36 = vsel %vm1556_vm2, %v2122_v58, 0.0 }
 0x351   : > { %v2184_v61 = vsel %vm1556_vm2, %v2117_v44, 0.0  ;;  %v2224_v26 = vmul.f32 %v2117_v44, %v2117_v44  ;;  %2329 = vst.msk [vmem:[%s4089_s27 + $0xf0] sm:$0xff] %vm1556_vm2, %v2117_v44  ;;  %v2287_v13 = vsel %vm1556_vm2, %v2225_v8, 0.0 }
 0x352   : > { %v2185_v45 = vadd.f32 %v2184_v61, %v2183_v52 }
 0x353   : > { %v2285_v14 = vsel %vm1556_vm2, %v2224_v26, 0.0 }
 0x354   : > { %v2187_v10 = vadd.f32 %v2186_v36, %v2185_v45  ;;  %v2286_v1 = vadd.f32 %v2285_v14, %v2284_v5 }
 0x356   : > { %v2188_v24 = vrot.slane %v2187_v10, 4  ;;  %v2288_v29 = vadd.f32 %v2287_v13, %v2286_v1 }
 0x358   : > { %v2189_v40 = vadd.f32 %v2188_v24, %v2187_v10  ;;  %v2289_v17 = vrot.slane %v2288_v29, 4 }
 0x35a   : > { %v2190_v33 = vrot.slane %v2189_v40, 2  ;;  %v2290_v22 = vadd.f32 %v2289_v17, %v2288_v29 }
 0x35c   : > { %v2191_v0 = vadd.f32 %v2190_v33, %v2189_v40  ;;  %v2291_v34 = vrot.slane %v2290_v22, 2 }
 0x35e   : > { %v2192_v39 = vrot.slane %v2191_v0, 1  ;;  %v2292_v32 = vadd.f32 %v2291_v34, %v2290_v22 }
 0x360   : > { %v2293_v63 = vrot.slane %v2292_v32, 1  ;;  %v2193_v4 = vadd.f32 %v2192_v39, %v2191_v0 }
 0x362   : > { %v2294_v2 = vadd.f32 %v2293_v63, %v2292_v32 }
 0x364   : > { %v2296_v31 = vsel %vm2295_vm10, %v2193_v4, %v2294_v2 }
 0x365   : > { %2298 = vst.msk [vmem:[%s198_s22] sm:$0x3] %vm2297_vm11, %v2296_v31 }
 0x366   : > { %2849 = shalt.err (!%p2846_p3)
}
 0x367   : > { %s2850_s11 = scalar_lea.hbm %s4426_s30, 32  ;;  %s2854_s13 = scalar_lea.hbm %s4465_s4, 64 }
 0x368   : > { %p2851_p4 = scmp.ne.s32.totalorder %s4426_s30, %s2850_s11  ;;  %p2855_p9 = scmp.lt.s32.totalorder %s4426_s30, %s4465_s4 }
 0x369   : > { %p2856_p10 = scmp.lt.s32.totalorder %s2854_s13, %s2850_s11 }
 0x36a   : > { %p2852_p7 = pnand %p2851_p4, %p2970_p5 }
 0x36b   : > { %p2857_p11 = por %p2856_p10, %p2855_p9 }
 0x36c   : > { %p2853_p8 = pneg %p2852_p7 }
 0x36e   : > { %p2858_p12 = pnand %p2857_p11, %p2853_p8 }
 0x370   : > { %2861 = shalt.err (!%p2858_p12)
}
 0x371   : > { %2782 = dma.vmem_to_hbm [thread:$0]  (%p2970_p5), %s2354_s23, 32, %s4426_s30, %s2337_s6  }
 0x372 PF: > { %p2788_p13 = scmp.ge.s32.totalorder %s2896_s18, 2  ;;  %s2373_s14 = sand.u32 1, %s2884_s15  }
 0x373   : > { %s2374_s20 = scalar_lea.sflag [#allocation3], %s2373_s14 }
 0x374   : > { %p2785_p0 = pnand %p2788_p13, %p2974_p6 }
 0x376   : > { %p2786_p1 = pneg %p2785_p0 }
 0x378   : > { %2879 = dma.done.wait (%p2786_p1), %s2374_s20, 32  }
 0x379   : > { %2881 = vsyncadd (%p2786_p1), %s2374_s20, 4294967264  ;;  %p15_p2 = scmp.ge.s32.totalorder %s2957_s21, 4   ;;  %s4592_s15 = smov %s2888_s16 }
 0x37a   : > { %s4593_s16 = smov %s2892_s17  ;;  %s4594_s17 = smov %s2968_s24 }
 0x37b   : > { %s4595_s18 = smov %s2957_s21  ;;  %17 = sbr.rel (!%p15_p2) target bundleno = 3 (0x3), region = 81 }
 0x380   :  { %2379 = vsyncpa [#allocation3], 1 }
 0x381   :  { %2381 = vsyncpa [#allocation3 + $0x1], 1 }

</bundles_post_ra>
